<compile_context>
chip_gen: v7x
topology: tpu7x:2x2x1
jax: 0.10.0
libtpu: 0.0.40
codegen_flags: <defaults>
</compile_context>

<pallas_src>
import jax
import jax.numpy as jnp
from jax import lax
from jax.experimental import pallas as pl
from jax.experimental.pallas import tpu as pltpu


# ----------------------------------------------------------------------------
# Pallas kernel
# ----------------------------------------------------------------------------
def decoder_kernel(
    # inputs
    x_ref,        # (T*B, D_in)  time-major-flat input
    h0_ref,       # (L, B, H)
    c0_ref,       # (L, B, H)
    wih0_ref,     # (D_in, 4H)   (pre-transposed weight_ih_l0)
    whh0_ref,     # (H,   4H)    (pre-transposed weight_hh_l0)
    b0_ref,       # (1,   4H)    (b_ih_l0 + b_hh_l0)
    wih1_ref,     # (H,   4H)
    whh1_ref,     # (H,   4H)
    b1_ref,       # (1,   4H)
    wfc_ref,      # (H,   O)     (pre-transposed fc.weight)
    bfc_ref,      # (1,   O)
    # outputs
    pred_ref,     # (T*B, O)
    hn_ref,       # (L, B, H)
    cn_ref,       # (L, B, H)
    # scratch
    xproj0_ref,   # (T*B, 4H)  hoisted layer-0 input projection
    y1_ref,       # (T*B, H)   layer-1 outputs (FC head input)
):
    TB, _ = x_ref.shape
    _, B, H = h0_ref.shape
    T = TB // B

    def row_of(t):
        r = t * B
        if B % 8 == 0:                       # static hint: sublane-aligned slices
            r = pl.multiple_of(r, 8)
        return r

    # ---- layer-0 input projection: one MXU matmul for all T steps ----------
    xproj0_ref[...] = (
        jnp.dot(x_ref[...], wih0_ref[...], preferred_element_type=jnp.float32)
        + b0_ref[...]
    )

    # Load weights once; they stay in vregs across the unrolled recurrence.
    whh0 = whh0_ref[...]
    whh1 = whh1_ref[...]
    wih1 = wih1_ref[...]
    b1 = b1_ref[...]

    def lstm_cell(pre_gates, h, c, whh):
        # Only the recurrent matmul sits on the serial chain.
        gates = pre_gates + jnp.dot(h, whh, preferred_element_type=jnp.float32)
        # Full-vreg nonlinearities: one sigmoid + one tanh EUP push each.
        sig = jax.nn.sigmoid(gates)
        th = jnp.tanh(gates)
        i_g = sig[:, 0 * H:1 * H]
        f_g = sig[:, 1 * H:2 * H]
        g_g = th[:, 2 * H:3 * H]
        o_g = sig[:, 3 * H:4 * H]
        c_new = f_g * c + i_g * g_g
        h_new = o_g * jnp.tanh(c_new)
        return h_new, c_new

    # ---- fused, software-pipelined 2-layer recurrence -----------------------
    # Prologue: layer-0 step 0; produce layer-1 pre-gates for its step 0.
    h0, c0 = lstm_cell(
        xproj0_ref[pl.ds(row_of(0), B), :], h0_ref[0], c0_ref[0], whh0)
    xp1 = jnp.dot(h0, wih1, preferred_element_type=jnp.float32) + b1

    h1 = h0_ref[1]
    c1 = c0_ref[1]

    def body(t, carry):
        h0, c0, h1, c1, xp1 = carry
        # layer-1 step t-1 (consumes pre-gates produced in the previous iter;
        # independent of layer-0's step t below -> chains overlap).
        h1n, c1n = lstm_cell(xp1, h1, c1, whh1)
        y1_ref[pl.ds(row_of(t - 1), B), :] = h1n
        # layer-0 step t.
        h0n, c0n = lstm_cell(
            xproj0_ref[pl.ds(row_of(t), B), :], h0, c0, whh0)
        # layer-1 pre-gates for step t (one iteration of slack -> off the
        # critical path).
        xp1n = jnp.dot(h0n, wih1, preferred_element_type=jnp.float32) + b1
        return h0n, c0n, h1n, c1n, xp1n

    unroll = True if T <= 16 else 8          # cap unroll for long sequences
    h0, c0, h1, c1, xp1 = lax.fori_loop(
        1, T, body, (h0, c0, h1, c1, xp1), unroll=unroll)

    # Epilogue: layer-1 step T-1.
    h1, c1 = lstm_cell(xp1, h1, c1, whh1)
    y1_ref[pl.ds(row_of(T - 1), B), :] = h1

    hn_ref[0] = h0
    cn_ref[0] = c0
    hn_ref[1] = h1
    cn_ref[1] = c1

    # ---- FC head: one batched matmul + one dense store ----------------------
    pred_ref[...] = (
        jnp.dot(y1_ref[...], wfc_ref[...], preferred_element_type=jnp.float32)
        + bfc_ref[...]
    ).astype(pred_ref.dtype)


# ----------------------------------------------------------------------------
# Wrapper
# ----------------------------------------------------------------------------
@jax.jit
def decoder_forward(x, h0, c0, params):
    """x: (B, T, D_in) batch_first, h0/c0: (L=2, B, H). Returns
    (prediction (B, T, O), (h_n, c_n))."""
    B, T, D = x.shape
    L, _, H = h0.shape
    assert L == 2, "kernel is specialized to the module's num_layers=2"
    O = params["w_fc"].shape[0]

    # Time-major, flattened to (T*B, D) so the kernel needs no reshapes.
    # (At these shapes the wrapper transpose is negligible; for very large
    #  T*B fold the time-major access into the kernel instead.)
    x_flat = jnp.transpose(x, (1, 0, 2)).reshape(T * B, D)

    # Pre-transpose weights (glue) so the kernel does x @ W directly.
    # PyTorch gate row-blocks (i|f|g|o) become column blocks and are sliced
    # in the same order inside the kernel.
    wih0 = params["w_ih0"].T            # (D, 4H)
    whh0 = params["w_hh0"].T            # (H, 4H)
    b0 = (params["b_ih0"] + params["b_hh0"]).reshape(1, 4 * H)
    wih1 = params["w_ih1"].T            # (H, 4H)
    whh1 = params["w_hh1"].T            # (H, 4H)
    b1 = (params["b_ih1"] + params["b_hh1"]).reshape(1, 4 * H)
    wfc = params["w_fc"].T              # (H, O)
    bfc = params["b_fc"].reshape(1, O)

    vmem = pl.BlockSpec(memory_space=pltpu.MemorySpace.VMEM)

    pred_flat, hn, cn = pl.pallas_call(
        decoder_kernel,
        out_shape=(
            jax.ShapeDtypeStruct((T * B, O), jnp.float32),
            jax.ShapeDtypeStruct((L, B, H), jnp.float32),
            jax.ShapeDtypeStruct((L, B, H), jnp.float32),
        ),
        in_specs=[vmem] * 11,
        out_specs=(vmem, vmem, vmem),
        scratch_shapes=[
            pltpu.VMEM((T * B, 4 * H), jnp.float32),   # layer-0 projections
            pltpu.VMEM((T * B, H), jnp.float32),       # layer-1 outputs
        ],
    )(x_flat, h0, c0, wih0, whh0, b0, wih1, whh1, b1, wfc, bfc)

    pred = jnp.transpose(pred_flat.reshape(T, B, O), (1, 0, 2))
    return pred, (hn, cn)


# ----------------------------------------------------------------------------
# Pure-JAX reference (for verification)
# ----------------------------------------------------------------------------
def decoder_reference(x, h0, c0, params):
    B, T, D = x.shape
    L, _, H = h0.shape

    def cell(xt, h, c, w_ih, w_hh, b_ih, b_hh):
        gates = xt @ w_ih.T + b_ih + h @ w_hh.T + b_hh
        i = jax.nn.sigmoid(gates[:, 0 * H:1 * H])
        f = jax.nn.sigmoid(gates[:, 1 * H:2 * H])
        g = jnp.tanh(gates[:, 2 * H:3 * H])
        o = jax.nn.sigmoid(gates[:, 3 * H:4 * H])
        c_new = f * c + i * g
        h_new = o * jnp.tanh(c_new)
        return h_new, c_new

    layer_in = x
    hs, cs = [], []
    for layer in range(L):
        w_ih = params[f"w_ih{layer}"]
        w_hh = params[f"w_hh{layer}"]
        b_ih = params[f"b_ih{layer}"]
        b_hh = params[f"b_hh{layer}"]
        h, c = h0[layer], c0[layer]
        outs = []
        for t in range(T):
            h, c = cell(layer_in[:, t, :], h, c, w_ih, w_hh, b_ih, b_hh)
            outs.append(h)
        layer_in = jnp.stack(outs, axis=1)
        hs.append(h)
        cs.append(c)
    pred = layer_in @ params["w_fc"].T + params["b_fc"]
    return pred, (jnp.stack(hs, 0), jnp.stack(cs, 0))


# ----------------------------------------------------------------------------
# Main
# ----------------------------------------------------------------------------
if __name__ == "__main__":
    # Small shapes consistent with the module's forward semantics.
    # B=8 keeps per-timestep views sublane-aligned.
    B, T = 8, 8
    INPUT_SIZE, HIDDEN_SIZE, OUTPUT_SIZE, NUM_LAYERS = 32, 32, 32, 2

    key = jax.random.PRNGKey(0)
    ks = jax.random.split(key, 16)
    k = 1.0 / jnp.sqrt(HIDDEN_SIZE)

    def u(rng, shape):
        return jax.random.uniform(rng, shape, jnp.float32, -k, k)

    params = {
        "w_ih0": u(ks[0], (4 * HIDDEN_SIZE, INPUT_SIZE)),
        "w_hh0": u(ks[1], (4 * HIDDEN_SIZE, HIDDEN_SIZE)),
        "b_ih0": u(ks[2], (4 * HIDDEN_SIZE,)),
        "b_hh0": u(ks[3], (4 * HIDDEN_SIZE,)),
        "w_ih1": u(ks[4], (4 * HIDDEN_SIZE, HIDDEN_SIZE)),
        "w_hh1": u(ks[5], (4 * HIDDEN_SIZE, HIDDEN_SIZE)),
        "b_ih1": u(ks[6], (4 * HIDDEN_SIZE,)),
        "b_hh1": u(ks[7], (4 * HIDDEN_SIZE,)),
        "w_fc": u(ks[8], (OUTPUT_SIZE, HIDDEN_SIZE)),
        "b_fc": u(ks[9], (OUTPUT_SIZE,)),
    }

    x = jax.random.normal(ks[10], (B, T, INPUT_SIZE), jnp.float32)
    h0 = jax.random.normal(ks[11], (NUM_LAYERS, B, HIDDEN_SIZE), jnp.float32)
    c0 = jax.random.normal(ks[12], (NUM_LAYERS, B, HIDDEN_SIZE), jnp.float32)

    pred, (hn, cn) = decoder_forward(x, h0, c0, params)
    jax.block_until_ready((pred, hn, cn))

    pred_ref, (hn_ref, cn_ref) = decoder_reference(x, h0, c0, params)
    assert pred.shape == (B, T, OUTPUT_SIZE)
    assert hn.shape == (NUM_LAYERS, B, HIDDEN_SIZE)
    assert cn.shape == (NUM_LAYERS, B, HIDDEN_SIZE)
    assert jnp.allclose(pred, pred_ref, atol=1e-4, rtol=1e-4)
    assert jnp.allclose(hn, hn_ref, atol=1e-4, rtol=1e-4)
    assert jnp.allclose(cn, cn_ref, atol=1e-4, rtol=1e-4)

    print("KERNEL_OK")
</pallas_src>

<mosaic_0001>
module attributes {stable_mosaic.version = 11 : i64} {
  func.func @decoder_kernel(%arg0: memref<64x32xf32, #tpu.memory_space<vmem>>, %arg1: memref<2x8x32xf32, #tpu.memory_space<vmem>>, %arg2: memref<2x8x32xf32, #tpu.memory_space<vmem>>, %arg3: memref<32x128xf32, #tpu.memory_space<vmem>>, %arg4: memref<32x128xf32, #tpu.memory_space<vmem>>, %arg5: memref<1x128xf32, #tpu.memory_space<vmem>>, %arg6: memref<32x128xf32, #tpu.memory_space<vmem>>, %arg7: memref<32x128xf32, #tpu.memory_space<vmem>>, %arg8: memref<1x128xf32, #tpu.memory_space<vmem>>, %arg9: memref<32x32xf32, #tpu.memory_space<vmem>>, %arg10: memref<1x32xf32, #tpu.memory_space<vmem>>, %arg11: memref<64x32xf32, #tpu.memory_space<vmem>>, %arg12: memref<2x8x32xf32, #tpu.memory_space<vmem>>, %arg13: memref<2x8x32xf32, #tpu.memory_space<vmem>>, %arg14: memref<64x128xf32, #tpu.memory_space<vmem>>, %arg15: memref<64x32xf32, #tpu.memory_space<vmem>>) attributes {dimension_semantics = [], scalar_prefetch = 0 : i64, scratch_operands = 2 : i64, tpu.core_type = #tpu.core_type<tc>} {
    %c0 = arith.constant 0 : index
    %c0_0 = arith.constant 0 : index
    %0 = vector.load %arg0[%c0, %c0_0] : memref<64x32xf32, #tpu.memory_space<vmem>>, vector<64x32xf32>
    %c0_1 = arith.constant 0 : index
    %c0_2 = arith.constant 0 : index
    %1 = vector.load %arg3[%c0_1, %c0_2] : memref<32x128xf32, #tpu.memory_space<vmem>>, vector<32x128xf32>
    %cst = arith.constant dense<0.000000e+00> : vector<64x128xf32>
    %2 = tpu.matmul %0, %1, %cst {dimension_numbers = #tpu.dot_dimension_numbers<[1], [0], [0], [1], [0, 0, 1, 1], [], []>} : vector<64x32xf32>, vector<32x128xf32>, vector<64x128xf32> -> vector<64x128xf32>
    %c0_3 = arith.constant 0 : index
    %c0_4 = arith.constant 0 : index
    %3 = vector.load %arg5[%c0_3, %c0_4] : memref<1x128xf32, #tpu.memory_space<vmem>>, vector<1x128xf32>
    %4 = vector.broadcast %3 : vector<1x128xf32> to vector<64x128xf32>
    %5 = arith.addf %2, %4 : vector<64x128xf32>
    %c0_5 = arith.constant 0 : index
    %c0_6 = arith.constant 0 : index
    %6 = vector.load %arg14[%c0_5, %c0_6] : memref<64x128xf32, #tpu.memory_space<vmem>>, vector<64x128xf32>
    tpu.vector_store %arg14[%c0_5, %c0_6], %5 {strides = array<i32>} : memref<64x128xf32, #tpu.memory_space<vmem>>, vector<64x128xf32>,
    %c0_7 = arith.constant 0 : index
    %c0_8 = arith.constant 0 : index
    %7 = vector.load %arg4[%c0_7, %c0_8] : memref<32x128xf32, #tpu.memory_space<vmem>>, vector<32x128xf32>
    %c0_9 = arith.constant 0 : index
    %c0_10 = arith.constant 0 : index
    %8 = vector.load %arg7[%c0_9, %c0_10] : memref<32x128xf32, #tpu.memory_space<vmem>>, vector<32x128xf32>
    %c0_11 = arith.constant 0 : index
    %c0_12 = arith.constant 0 : index
    %9 = vector.load %arg6[%c0_11, %c0_12] : memref<32x128xf32, #tpu.memory_space<vmem>>, vector<32x128xf32>
    %c0_13 = arith.constant 0 : index
    %c0_14 = arith.constant 0 : index
    %10 = vector.load %arg8[%c0_13, %c0_14] : memref<1x128xf32, #tpu.memory_space<vmem>>, vector<1x128xf32>
    %c0_i32 = arith.constant 0 : i32
    %11 = tpu.assume_multiple %c0_i32, 8 : i32
    %12 = arith.index_cast %11 : i32 to index
    %c0_15 = arith.constant 0 : index
    %13 = vector.load %arg14[%12, %c0_15] : memref<64x128xf32, #tpu.memory_space<vmem>>, vector<8x128xf32>
    %c0_16 = arith.constant 0 : index
    %c0_17 = arith.constant 0 : index
    %c0_18 = arith.constant 0 : index
    %14 = vector.load %arg1[%c0_16, %c0_17, %c0_18] : memref<2x8x32xf32, #tpu.memory_space<vmem>>, vector<1x8x32xf32>
    %15 = vector.shape_cast %14 : vector<1x8x32xf32> to vector<8x32xf32>
    %c0_19 = arith.constant 0 : index
    %c0_20 = arith.constant 0 : index
    %c0_21 = arith.constant 0 : index
    %16 = vector.load %arg2[%c0_19, %c0_20, %c0_21] : memref<2x8x32xf32, #tpu.memory_space<vmem>>, vector<1x8x32xf32>
    %17 = vector.shape_cast %16 : vector<1x8x32xf32> to vector<8x32xf32>
    %cst_22 = arith.constant dense<0.000000e+00> : vector<8x128xf32>
    %18 = tpu.matmul %15, %7, %cst_22 {dimension_numbers = #tpu.dot_dimension_numbers<[1], [0], [0], [1], [0, 0, 1, 1], [], []>} : vector<8x32xf32>, vector<32x128xf32>, vector<8x128xf32> -> vector<8x128xf32>
    %19 = arith.addf %13, %18 : vector<8x128xf32>
    %20 = arith.negf %19 : vector<8x128xf32>
    %21 = math.exp %20 : vector<8x128xf32>
    %cst_23 = arith.constant 1.000000e+00 : f32
    %22 = vector.broadcast %cst_23 : f32 to vector<8x128xf32>
    %23 = arith.addf %22, %21 : vector<8x128xf32>
    %24 = arith.divf %22, %23 : vector<8x128xf32>
    %25 = math.tanh %19 : vector<8x128xf32>
    %26 = vector.extract_strided_slice %24 {offsets = [0, 0], sizes = [8, 32], strides = [1, 1]} : vector<8x128xf32> to vector<8x32xf32>
    %27 = vector.extract_strided_slice %24 {offsets = [0, 32], sizes = [8, 32], strides = [1, 1]} : vector<8x128xf32> to vector<8x32xf32>
    %28 = vector.extract_strided_slice %25 {offsets = [0, 64], sizes = [8, 32], strides = [1, 1]} : vector<8x128xf32> to vector<8x32xf32>
    %29 = vector.extract_strided_slice %24 {offsets = [0, 96], sizes = [8, 32], strides = [1, 1]} : vector<8x128xf32> to vector<8x32xf32>
    %30 = arith.mulf %27, %17 : vector<8x32xf32>
    %31 = arith.mulf %26, %28 : vector<8x32xf32>
    %32 = arith.addf %30, %31 : vector<8x32xf32>
    %33 = math.tanh %32 : vector<8x32xf32>
    %34 = arith.mulf %29, %33 : vector<8x32xf32>
    %cst_24 = arith.constant dense<0.000000e+00> : vector<8x128xf32>
    %35 = tpu.matmul %34, %9, %cst_24 {dimension_numbers = #tpu.dot_dimension_numbers<[1], [0], [0], [1], [0, 0, 1, 1], [], []>} : vector<8x32xf32>, vector<32x128xf32>, vector<8x128xf32> -> vector<8x128xf32>
    %36 = vector.broadcast %10 : vector<1x128xf32> to vector<8x128xf32>
    %37 = arith.addf %35, %36 : vector<8x128xf32>
    %c1 = arith.constant 1 : index
    %c0_25 = arith.constant 0 : index
    %c0_26 = arith.constant 0 : index
    %38 = vector.load %arg1[%c1, %c0_25, %c0_26] : memref<2x8x32xf32, #tpu.memory_space<vmem>>, vector<1x8x32xf32>
    %39 = vector.shape_cast %38 : vector<1x8x32xf32> to vector<8x32xf32>
    %c1_27 = arith.constant 1 : index
    %c0_28 = arith.constant 0 : index
    %c0_29 = arith.constant 0 : index
    %40 = vector.load %arg2[%c1_27, %c0_28, %c0_29] : memref<2x8x32xf32, #tpu.memory_space<vmem>>, vector<1x8x32xf32>
    %41 = vector.shape_cast %40 : vector<1x8x32xf32> to vector<8x32xf32>
    %c1_i32 = arith.constant 1 : i32
    %cst_30 = arith.constant dense<0.000000e+00> : vector<8x128xf32>
    %42 = tpu.matmul %39, %8, %cst_30 {dimension_numbers = #tpu.dot_dimension_numbers<[1], [0], [0], [1], [0, 0, 1, 1], [], []>} : vector<8x32xf32>, vector<32x128xf32>, vector<8x128xf32> -> vector<8x128xf32>
    %43 = arith.addf %37, %42 : vector<8x128xf32>
    %44 = arith.negf %43 : vector<8x128xf32>
    %45 = math.exp %44 : vector<8x128xf32>
    %cst_31 = arith.constant 1.000000e+00 : f32
    %46 = vector.broadcast %cst_31 : f32 to vector<8x128xf32>
    %47 = arith.addf %46, %45 : vector<8x128xf32>
    %48 = arith.divf %46, %47 : vector<8x128xf32>
    %49 = math.tanh %43 : vector<8x128xf32>
    %50 = vector.extract_strided_slice %48 {offsets = [0, 0], sizes = [8, 32], strides = [1, 1]} : vector<8x128xf32> to vector<8x32xf32>
    %51 = vector.extract_strided_slice %48 {offsets = [0, 32], sizes = [8, 32], strides = [1, 1]} : vector<8x128xf32> to vector<8x32xf32>
    %52 = vector.extract_strided_slice %49 {offsets = [0, 64], sizes = [8, 32], strides = [1, 1]} : vector<8x128xf32> to vector<8x32xf32>
    %53 = vector.extract_strided_slice %48 {offsets = [0, 96], sizes = [8, 32], strides = [1, 1]} : vector<8x128xf32> to vector<8x32xf32>
    %54 = arith.mulf %51, %41 : vector<8x32xf32>
    %55 = arith.mulf %50, %52 : vector<8x32xf32>
    %56 = arith.addf %54, %55 : vector<8x32xf32>
    %57 = math.tanh %56 : vector<8x32xf32>
    %58 = arith.mulf %53, %57 : vector<8x32xf32>
    %c1_i32_32 = arith.constant 1 : i32
    %59 = arith.subi %c1_i32, %c1_i32_32 : i32
    %c8_i32 = arith.constant 8 : i32
    %60 = arith.muli %59, %c8_i32 : i32
    %61 = tpu.assume_multiple %60, 8 : i32
    %62 = arith.index_cast %61 : i32 to index
    %c0_33 = arith.constant 0 : index
    %63 = vector.load %arg15[%62, %c0_33] : memref<64x32xf32, #tpu.memory_space<vmem>>, vector<8x32xf32>
    tpu.vector_store %arg15[%62, %c0_33], %58 {strides = array<i32>} : memref<64x32xf32, #tpu.memory_space<vmem>>, vector<8x32xf32>,
    %c8_i32_34 = arith.constant 8 : i32
    %64 = arith.muli %c1_i32, %c8_i32_34 : i32
    %65 = tpu.assume_multiple %64, 8 : i32
    %66 = arith.index_cast %65 : i32 to index
    %c0_35 = arith.constant 0 : index
    %67 = vector.load %arg14[%66, %c0_35] : memref<64x128xf32, #tpu.memory_space<vmem>>, vector<8x128xf32>
    %cst_36 = arith.constant dense<0.000000e+00> : vector<8x128xf32>
    %68 = tpu.matmul %34, %7, %cst_36 {dimension_numbers = #tpu.dot_dimension_numbers<[1], [0], [0], [1], [0, 0, 1, 1], [], []>} : vector<8x32xf32>, vector<32x128xf32>, vector<8x128xf32> -> vector<8x128xf32>
    %69 = arith.addf %67, %68 : vector<8x128xf32>
    %70 = arith.negf %69 : vector<8x128xf32>
    %71 = math.exp %70 : vector<8x128xf32>
    %cst_37 = arith.constant 1.000000e+00 : f32
    %72 = vector.broadcast %cst_37 : f32 to vector<8x128xf32>
    %73 = arith.addf %72, %71 : vector<8x128xf32>
    %74 = arith.divf %72, %73 : vector<8x128xf32>
    %75 = math.tanh %69 : vector<8x128xf32>
    %76 = vector.extract_strided_slice %74 {offsets = [0, 0], sizes = [8, 32], strides = [1, 1]} : vector<8x128xf32> to vector<8x32xf32>
    %77 = vector.extract_strided_slice %74 {offsets = [0, 32], sizes = [8, 32], strides = [1, 1]} : vector<8x128xf32> to vector<8x32xf32>
    %78 = vector.extract_strided_slice %75 {offsets = [0, 64], sizes = [8, 32], strides = [1, 1]} : vector<8x128xf32> to vector<8x32xf32>
    %79 = vector.extract_strided_slice %74 {offsets = [0, 96], sizes = [8, 32], strides = [1, 1]} : vector<8x128xf32> to vector<8x32xf32>
    %80 = arith.mulf %77, %32 : vector<8x32xf32>
    %81 = arith.mulf %76, %78 : vector<8x32xf32>
    %82 = arith.addf %80, %81 : vector<8x32xf32>
    %83 = math.tanh %82 : vector<8x32xf32>
    %84 = arith.mulf %79, %83 : vector<8x32xf32>
    %cst_38 = arith.constant dense<0.000000e+00> : vector<8x128xf32>
    %85 = tpu.matmul %84, %9, %cst_38 {dimension_numbers = #tpu.dot_dimension_numbers<[1], [0], [0], [1], [0, 0, 1, 1], [], []>} : vector<8x32xf32>, vector<32x128xf32>, vector<8x128xf32> -> vector<8x128xf32>
    %86 = vector.broadcast %10 : vector<1x128xf32> to vector<8x128xf32>
    %87 = arith.addf %85, %86 : vector<8x128xf32>
    %c2_i32 = arith.constant 2 : i32
    %cst_39 = arith.constant dense<0.000000e+00> : vector<8x128xf32>
    %88 = tpu.matmul %58, %8, %cst_39 {dimension_numbers = #tpu.dot_dimension_numbers<[1], [0], [0], [1], [0, 0, 1, 1], [], []>} : vector<8x32xf32>, vector<32x128xf32>, vector<8x128xf32> -> vector<8x128xf32>
    %89 = arith.addf %87, %88 : vector<8x128xf32>
    %90 = arith.negf %89 : vector<8x128xf32>
    %91 = math.exp %90 : vector<8x128xf32>
    %cst_40 = arith.constant 1.000000e+00 : f32
    %92 = vector.broadcast %cst_40 : f32 to vector<8x128xf32>
    %93 = arith.addf %92, %91 : vector<8x128xf32>
    %94 = arith.divf %92, %93 : vector<8x128xf32>
    %95 = math.tanh %89 : vector<8x128xf32>
    %96 = vector.extract_strided_slice %94 {offsets = [0, 0], sizes = [8, 32], strides = [1, 1]} : vector<8x128xf32> to vector<8x32xf32>
    %97 = vector.extract_strided_slice %94 {offsets = [0, 32], sizes = [8, 32], strides = [1, 1]} : vector<8x128xf32> to vector<8x32xf32>
    %98 = vector.extract_strided_slice %95 {offsets = [0, 64], sizes = [8, 32], strides = [1, 1]} : vector<8x128xf32> to vector<8x32xf32>
    %99 = vector.extract_strided_slice %94 {offsets = [0, 96], sizes = [8, 32], strides = [1, 1]} : vector<8x128xf32> to vector<8x32xf32>
    %100 = arith.mulf %97, %56 : vector<8x32xf32>
    %101 = arith.mulf %96, %98 : vector<8x32xf32>
    %102 = arith.addf %100, %101 : vector<8x32xf32>
    %103 = math.tanh %102 : vector<8x32xf32>
    %104 = arith.mulf %99, %103 : vector<8x32xf32>
    %c1_i32_41 = arith.constant 1 : i32
    %105 = arith.subi %c2_i32, %c1_i32_41 : i32
    %c8_i32_42 = arith.constant 8 : i32
    %106 = arith.muli %105, %c8_i32_42 : i32
    %107 = tpu.assume_multiple %106, 8 : i32
    %108 = arith.index_cast %107 : i32 to index
    %c0_43 = arith.constant 0 : index
    %109 = vector.load %arg15[%108, %c0_43] : memref<64x32xf32, #tpu.memory_space<vmem>>, vector<8x32xf32>
    tpu.vector_store %arg15[%108, %c0_43], %104 {strides = array<i32>} : memref<64x32xf32, #tpu.memory_space<vmem>>, vector<8x32xf32>,
    %c8_i32_44 = arith.constant 8 : i32
    %110 = arith.muli %c2_i32, %c8_i32_44 : i32
    %111 = tpu.assume_multiple %110, 8 : i32
    %112 = arith.index_cast %111 : i32 to index
    %c0_45 = arith.constant 0 : index
    %113 = vector.load %arg14[%112, %c0_45] : memref<64x128xf32, #tpu.memory_space<vmem>>, vector<8x128xf32>
    %cst_46 = arith.constant dense<0.000000e+00> : vector<8x128xf32>
    %114 = tpu.matmul %84, %7, %cst_46 {dimension_numbers = #tpu.dot_dimension_numbers<[1], [0], [0], [1], [0, 0, 1, 1], [], []>} : vector<8x32xf32>, vector<32x128xf32>, vector<8x128xf32> -> vector<8x128xf32>
    %115 = arith.addf %113, %114 : vector<8x128xf32>
    %116 = arith.negf %115 : vector<8x128xf32>
    %117 = math.exp %116 : vector<8x128xf32>
    %cst_47 = arith.constant 1.000000e+00 : f32
    %118 = vector.broadcast %cst_47 : f32 to vector<8x128xf32>
    %119 = arith.addf %118, %117 : vector<8x128xf32>
    %120 = arith.divf %118, %119 : vector<8x128xf32>
    %121 = math.tanh %115 : vector<8x128xf32>
    %122 = vector.extract_strided_slice %120 {offsets = [0, 0], sizes = [8, 32], strides = [1, 1]} : vector<8x128xf32> to vector<8x32xf32>
    %123 = vector.extract_strided_slice %120 {offsets = [0, 32], sizes = [8, 32], strides = [1, 1]} : vector<8x128xf32> to vector<8x32xf32>
    %124 = vector.extract_strided_slice %121 {offsets = [0, 64], sizes = [8, 32], strides = [1, 1]} : vector<8x128xf32> to vector<8x32xf32>
    %125 = vector.extract_strided_slice %120 {offsets = [0, 96], sizes = [8, 32], strides = [1, 1]} : vector<8x128xf32> to vector<8x32xf32>
    %126 = arith.mulf %123, %82 : vector<8x32xf32>
    %127 = arith.mulf %122, %124 : vector<8x32xf32>
    %128 = arith.addf %126, %127 : vector<8x32xf32>
    %129 = math.tanh %128 : vector<8x32xf32>
    %130 = arith.mulf %125, %129 : vector<8x32xf32>
    %cst_48 = arith.constant dense<0.000000e+00> : vector<8x128xf32>
    %131 = tpu.matmul %130, %9, %cst_48 {dimension_numbers = #tpu.dot_dimension_numbers<[1], [0], [0], [1], [0, 0, 1, 1], [], []>} : vector<8x32xf32>, vector<32x128xf32>, vector<8x128xf32> -> vector<8x128xf32>
    %132 = vector.broadcast %10 : vector<1x128xf32> to vector<8x128xf32>
    %133 = arith.addf %131, %132 : vector<8x128xf32>
    %c3_i32 = arith.constant 3 : i32
    %cst_49 = arith.constant dense<0.000000e+00> : vector<8x128xf32>
    %134 = tpu.matmul %104, %8, %cst_49 {dimension_numbers = #tpu.dot_dimension_numbers<[1], [0], [0], [1], [0, 0, 1, 1], [], []>} : vector<8x32xf32>, vector<32x128xf32>, vector<8x128xf32> -> vector<8x128xf32>
    %135 = arith.addf %133, %134 : vector<8x128xf32>
    %136 = arith.negf %135 : vector<8x128xf32>
    %137 = math.exp %136 : vector<8x128xf32>
    %cst_50 = arith.constant 1.000000e+00 : f32
    %138 = vector.broadcast %cst_50 : f32 to vector<8x128xf32>
    %139 = arith.addf %138, %137 : vector<8x128xf32>
    %140 = arith.divf %138, %139 : vector<8x128xf32>
    %141 = math.tanh %135 : vector<8x128xf32>
    %142 = vector.extract_strided_slice %140 {offsets = [0, 0], sizes = [8, 32], strides = [1, 1]} : vector<8x128xf32> to vector<8x32xf32>
    %143 = vector.extract_strided_slice %140 {offsets = [0, 32], sizes = [8, 32], strides = [1, 1]} : vector<8x128xf32> to vector<8x32xf32>
    %144 = vector.extract_strided_slice %141 {offsets = [0, 64], sizes = [8, 32], strides = [1, 1]} : vector<8x128xf32> to vector<8x32xf32>
    %145 = vector.extract_strided_slice %140 {offsets = [0, 96], sizes = [8, 32], strides = [1, 1]} : vector<8x128xf32> to vector<8x32xf32>
    %146 = arith.mulf %143, %102 : vector<8x32xf32>
    %147 = arith.mulf %142, %144 : vector<8x32xf32>
    %148 = arith.addf %146, %147 : vector<8x32xf32>
    %149 = math.tanh %148 : vector<8x32xf32>
    %150 = arith.mulf %145, %149 : vector<8x32xf32>
    %c1_i32_51 = arith.constant 1 : i32
    %151 = arith.subi %c3_i32, %c1_i32_51 : i32
    %c8_i32_52 = arith.constant 8 : i32
    %152 = arith.muli %151, %c8_i32_52 : i32
    %153 = tpu.assume_multiple %152, 8 : i32
    %154 = arith.index_cast %153 : i32 to index
    %c0_53 = arith.constant 0 : index
    %155 = vector.load %arg15[%154, %c0_53] : memref<64x32xf32, #tpu.memory_space<vmem>>, vector<8x32xf32>
    tpu.vector_store %arg15[%154, %c0_53], %150 {strides = array<i32>} : memref<64x32xf32, #tpu.memory_space<vmem>>, vector<8x32xf32>,
    %c8_i32_54 = arith.constant 8 : i32
    %156 = arith.muli %c3_i32, %c8_i32_54 : i32
    %157 = tpu.assume_multiple %156, 8 : i32
    %158 = arith.index_cast %157 : i32 to index
    %c0_55 = arith.constant 0 : index
    %159 = vector.load %arg14[%158, %c0_55] : memref<64x128xf32, #tpu.memory_space<vmem>>, vector<8x128xf32>
    %cst_56 = arith.constant dense<0.000000e+00> : vector<8x128xf32>
    %160 = tpu.matmul %130, %7, %cst_56 {dimension_numbers = #tpu.dot_dimension_numbers<[1], [0], [0], [1], [0, 0, 1, 1], [], []>} : vector<8x32xf32>, vector<32x128xf32>, vector<8x128xf32> -> vector<8x128xf32>
    %161 = arith.addf %159, %160 : vector<8x128xf32>
    %162 = arith.negf %161 : vector<8x128xf32>
    %163 = math.exp %162 : vector<8x128xf32>
    %cst_57 = arith.constant 1.000000e+00 : f32
    %164 = vector.broadcast %cst_57 : f32 to vector<8x128xf32>
    %165 = arith.addf %164, %163 : vector<8x128xf32>
    %166 = arith.divf %164, %165 : vector<8x128xf32>
    %167 = math.tanh %161 : vector<8x128xf32>
    %168 = vector.extract_strided_slice %166 {offsets = [0, 0], sizes = [8, 32], strides = [1, 1]} : vector<8x128xf32> to vector<8x32xf32>
    %169 = vector.extract_strided_slice %166 {offsets = [0, 32], sizes = [8, 32], strides = [1, 1]} : vector<8x128xf32> to vector<8x32xf32>
    %170 = vector.extract_strided_slice %167 {offsets = [0, 64], sizes = [8, 32], strides = [1, 1]} : vector<8x128xf32> to vector<8x32xf32>
    %171 = vector.extract_strided_slice %166 {offsets = [0, 96], sizes = [8, 32], strides = [1, 1]} : vector<8x128xf32> to vector<8x32xf32>
    %172 = arith.mulf %169, %128 : vector<8x32xf32>
    %173 = arith.mulf %168, %170 : vector<8x32xf32>
    %174 = arith.addf %172, %173 : vector<8x32xf32>
    %175 = math.tanh %174 : vector<8x32xf32>
    %176 = arith.mulf %171, %175 : vector<8x32xf32>
    %cst_58 = arith.constant dense<0.000000e+00> : vector<8x128xf32>
    %177 = tpu.matmul %176, %9, %cst_58 {dimension_numbers = #tpu.dot_dimension_numbers<[1], [0], [0], [1], [0, 0, 1, 1], [], []>} : vector<8x32xf32>, vector<32x128xf32>, vector<8x128xf32> -> vector<8x128xf32>
    %178 = vector.broadcast %10 : vector<1x128xf32> to vector<8x128xf32>
    %179 = arith.addf %177, %178 : vector<8x128xf32>
    %c4_i32 = arith.constant 4 : i32
    %cst_59 = arith.constant dense<0.000000e+00> : vector<8x128xf32>
    %180 = tpu.matmul %150, %8, %cst_59 {dimension_numbers = #tpu.dot_dimension_numbers<[1], [0], [0], [1], [0, 0, 1, 1], [], []>} : vector<8x32xf32>, vector<32x128xf32>, vector<8x128xf32> -> vector<8x128xf32>
    %181 = arith.addf %179, %180 : vector<8x128xf32>
    %182 = arith.negf %181 : vector<8x128xf32>
    %183 = math.exp %182 : vector<8x128xf32>
    %cst_60 = arith.constant 1.000000e+00 : f32
    %184 = vector.broadcast %cst_60 : f32 to vector<8x128xf32>
    %185 = arith.addf %184, %183 : vector<8x128xf32>
    %186 = arith.divf %184, %185 : vector<8x128xf32>
    %187 = math.tanh %181 : vector<8x128xf32>
    %188 = vector.extract_strided_slice %186 {offsets = [0, 0], sizes = [8, 32], strides = [1, 1]} : vector<8x128xf32> to vector<8x32xf32>
    %189 = vector.extract_strided_slice %186 {offsets = [0, 32], sizes = [8, 32], strides = [1, 1]} : vector<8x128xf32> to vector<8x32xf32>
    %190 = vector.extract_strided_slice %187 {offsets = [0, 64], sizes = [8, 32], strides = [1, 1]} : vector<8x128xf32> to vector<8x32xf32>
    %191 = vector.extract_strided_slice %186 {offsets = [0, 96], sizes = [8, 32], strides = [1, 1]} : vector<8x128xf32> to vector<8x32xf32>
    %192 = arith.mulf %189, %148 : vector<8x32xf32>
    %193 = arith.mulf %188, %190 : vector<8x32xf32>
    %194 = arith.addf %192, %193 : vector<8x32xf32>
    %195 = math.tanh %194 : vector<8x32xf32>
    %196 = arith.mulf %191, %195 : vector<8x32xf32>
    %c1_i32_61 = arith.constant 1 : i32
    %197 = arith.subi %c4_i32, %c1_i32_61 : i32
    %c8_i32_62 = arith.constant 8 : i32
    %198 = arith.muli %197, %c8_i32_62 : i32
    %199 = tpu.assume_multiple %198, 8 : i32
    %200 = arith.index_cast %199 : i32 to index
    %c0_63 = arith.constant 0 : index
    %201 = vector.load %arg15[%200, %c0_63] : memref<64x32xf32, #tpu.memory_space<vmem>>, vector<8x32xf32>
    tpu.vector_store %arg15[%200, %c0_63], %196 {strides = array<i32>} : memref<64x32xf32, #tpu.memory_space<vmem>>, vector<8x32xf32>,
    %c8_i32_64 = arith.constant 8 : i32
    %202 = arith.muli %c4_i32, %c8_i32_64 : i32
    %203 = tpu.assume_multiple %202, 8 : i32
    %204 = arith.index_cast %203 : i32 to index
    %c0_65 = arith.constant 0 : index
    %205 = vector.load %arg14[%204, %c0_65] : memref<64x128xf32, #tpu.memory_space<vmem>>, vector<8x128xf32>
    %cst_66 = arith.constant dense<0.000000e+00> : vector<8x128xf32>
    %206 = tpu.matmul %176, %7, %cst_66 {dimension_numbers = #tpu.dot_dimension_numbers<[1], [0], [0], [1], [0, 0, 1, 1], [], []>} : vector<8x32xf32>, vector<32x128xf32>, vector<8x128xf32> -> vector<8x128xf32>
    %207 = arith.addf %205, %206 : vector<8x128xf32>
    %208 = arith.negf %207 : vector<8x128xf32>
    %209 = math.exp %208 : vector<8x128xf32>
    %cst_67 = arith.constant 1.000000e+00 : f32
    %210 = vector.broadcast %cst_67 : f32 to vector<8x128xf32>
    %211 = arith.addf %210, %209 : vector<8x128xf32>
    %212 = arith.divf %210, %211 : vector<8x128xf32>
    %213 = math.tanh %207 : vector<8x128xf32>
    %214 = vector.extract_strided_slice %212 {offsets = [0, 0], sizes = [8, 32], strides = [1, 1]} : vector<8x128xf32> to vector<8x32xf32>
    %215 = vector.extract_strided_slice %212 {offsets = [0, 32], sizes = [8, 32], strides = [1, 1]} : vector<8x128xf32> to vector<8x32xf32>
    %216 = vector.extract_strided_slice %213 {offsets = [0, 64], sizes = [8, 32], strides = [1, 1]} : vector<8x128xf32> to vector<8x32xf32>
    %217 = vector.extract_strided_slice %212 {offsets = [0, 96], sizes = [8, 32], strides = [1, 1]} : vector<8x128xf32> to vector<8x32xf32>
    %218 = arith.mulf %215, %174 : vector<8x32xf32>
    %219 = arith.mulf %214, %216 : vector<8x32xf32>
    %220 = arith.addf %218, %219 : vector<8x32xf32>
    %221 = math.tanh %220 : vector<8x32xf32>
    %222 = arith.mulf %217, %221 : vector<8x32xf32>
    %cst_68 = arith.constant dense<0.000000e+00> : vector<8x128xf32>
    %223 = tpu.matmul %222, %9, %cst_68 {dimension_numbers = #tpu.dot_dimension_numbers<[1], [0], [0], [1], [0, 0, 1, 1], [], []>} : vector<8x32xf32>, vector<32x128xf32>, vector<8x128xf32> -> vector<8x128xf32>
    %224 = vector.broadcast %10 : vector<1x128xf32> to vector<8x128xf32>
    %225 = arith.addf %223, %224 : vector<8x128xf32>
    %c5_i32 = arith.constant 5 : i32
    %cst_69 = arith.constant dense<0.000000e+00> : vector<8x128xf32>
    %226 = tpu.matmul %196, %8, %cst_69 {dimension_numbers = #tpu.dot_dimension_numbers<[1], [0], [0], [1], [0, 0, 1, 1], [], []>} : vector<8x32xf32>, vector<32x128xf32>, vector<8x128xf32> -> vector<8x128xf32>
    %227 = arith.addf %225, %226 : vector<8x128xf32>
    %228 = arith.negf %227 : vector<8x128xf32>
    %229 = math.exp %228 : vector<8x128xf32>
    %cst_70 = arith.constant 1.000000e+00 : f32
    %230 = vector.broadcast %cst_70 : f32 to vector<8x128xf32>
    %231 = arith.addf %230, %229 : vector<8x128xf32>
    %232 = arith.divf %230, %231 : vector<8x128xf32>
    %233 = math.tanh %227 : vector<8x128xf32>
    %234 = vector.extract_strided_slice %232 {offsets = [0, 0], sizes = [8, 32], strides = [1, 1]} : vector<8x128xf32> to vector<8x32xf32>
    %235 = vector.extract_strided_slice %232 {offsets = [0, 32], sizes = [8, 32], strides = [1, 1]} : vector<8x128xf32> to vector<8x32xf32>
    %236 = vector.extract_strided_slice %233 {offsets = [0, 64], sizes = [8, 32], strides = [1, 1]} : vector<8x128xf32> to vector<8x32xf32>
    %237 = vector.extract_strided_slice %232 {offsets = [0, 96], sizes = [8, 32], strides = [1, 1]} : vector<8x128xf32> to vector<8x32xf32>
    %238 = arith.mulf %235, %194 : vector<8x32xf32>
    %239 = arith.mulf %234, %236 : vector<8x32xf32>
    %240 = arith.addf %238, %239 : vector<8x32xf32>
    %241 = math.tanh %240 : vector<8x32xf32>
    %242 = arith.mulf %237, %241 : vector<8x32xf32>
    %c1_i32_71 = arith.constant 1 : i32
    %243 = arith.subi %c5_i32, %c1_i32_71 : i32
    %c8_i32_72 = arith.constant 8 : i32
    %244 = arith.muli %243, %c8_i32_72 : i32
    %245 = tpu.assume_multiple %244, 8 : i32
    %246 = arith.index_cast %245 : i32 to index
    %c0_73 = arith.constant 0 : index
    %247 = vector.load %arg15[%246, %c0_73] : memref<64x32xf32, #tpu.memory_space<vmem>>, vector<8x32xf32>
    tpu.vector_store %arg15[%246, %c0_73], %242 {strides = array<i32>} : memref<64x32xf32, #tpu.memory_space<vmem>>, vector<8x32xf32>,
    %c8_i32_74 = arith.constant 8 : i32
    %248 = arith.muli %c5_i32, %c8_i32_74 : i32
    %249 = tpu.assume_multiple %248, 8 : i32
    %250 = arith.index_cast %249 : i32 to index
    %c0_75 = arith.constant 0 : index
    %251 = vector.load %arg14[%250, %c0_75] : memref<64x128xf32, #tpu.memory_space<vmem>>, vector<8x128xf32>
    %cst_76 = arith.constant dense<0.000000e+00> : vector<8x128xf32>
    %252 = tpu.matmul %222, %7, %cst_76 {dimension_numbers = #tpu.dot_dimension_numbers<[1], [0], [0], [1], [0, 0, 1, 1], [], []>} : vector<8x32xf32>, vector<32x128xf32>, vector<8x128xf32> -> vector<8x128xf32>
    %253 = arith.addf %251, %252 : vector<8x128xf32>
    %254 = arith.negf %253 : vector<8x128xf32>
    %255 = math.exp %254 : vector<8x128xf32>
    %cst_77 = arith.constant 1.000000e+00 : f32
    %256 = vector.broadcast %cst_77 : f32 to vector<8x128xf32>
    %257 = arith.addf %256, %255 : vector<8x128xf32>
    %258 = arith.divf %256, %257 : vector<8x128xf32>
    %259 = math.tanh %253 : vector<8x128xf32>
    %260 = vector.extract_strided_slice %258 {offsets = [0, 0], sizes = [8, 32], strides = [1, 1]} : vector<8x128xf32> to vector<8x32xf32>
    %261 = vector.extract_strided_slice %258 {offsets = [0, 32], sizes = [8, 32], strides = [1, 1]} : vector<8x128xf32> to vector<8x32xf32>
    %262 = vector.extract_strided_slice %259 {offsets = [0, 64], sizes = [8, 32], strides = [1, 1]} : vector<8x128xf32> to vector<8x32xf32>
    %263 = vector.extract_strided_slice %258 {offsets = [0, 96], sizes = [8, 32], strides = [1, 1]} : vector<8x128xf32> to vector<8x32xf32>
    %264 = arith.mulf %261, %220 : vector<8x32xf32>
    %265 = arith.mulf %260, %262 : vector<8x32xf32>
    %266 = arith.addf %264, %265 : vector<8x32xf32>
    %267 = math.tanh %266 : vector<8x32xf32>
    %268 = arith.mulf %263, %267 : vector<8x32xf32>
    %cst_78 = arith.constant dense<0.000000e+00> : vector<8x128xf32>
    %269 = tpu.matmul %268, %9, %cst_78 {dimension_numbers = #tpu.dot_dimension_numbers<[1], [0], [0], [1], [0, 0, 1, 1], [], []>} : vector<8x32xf32>, vector<32x128xf32>, vector<8x128xf32> -> vector<8x128xf32>
    %270 = vector.broadcast %10 : vector<1x128xf32> to vector<8x128xf32>
    %271 = arith.addf %269, %270 : vector<8x128xf32>
    %c6_i32 = arith.constant 6 : i32
    %cst_79 = arith.constant dense<0.000000e+00> : vector<8x128xf32>
    %272 = tpu.matmul %242, %8, %cst_79 {dimension_numbers = #tpu.dot_dimension_numbers<[1], [0], [0], [1], [0, 0, 1, 1], [], []>} : vector<8x32xf32>, vector<32x128xf32>, vector<8x128xf32> -> vector<8x128xf32>
    %273 = arith.addf %271, %272 : vector<8x128xf32>
    %274 = arith.negf %273 : vector<8x128xf32>
    %275 = math.exp %274 : vector<8x128xf32>
    %cst_80 = arith.constant 1.000000e+00 : f32
    %276 = vector.broadcast %cst_80 : f32 to vector<8x128xf32>
    %277 = arith.addf %276, %275 : vector<8x128xf32>
    %278 = arith.divf %276, %277 : vector<8x128xf32>
    %279 = math.tanh %273 : vector<8x128xf32>
    %280 = vector.extract_strided_slice %278 {offsets = [0, 0], sizes = [8, 32], strides = [1, 1]} : vector<8x128xf32> to vector<8x32xf32>
    %281 = vector.extract_strided_slice %278 {offsets = [0, 32], sizes = [8, 32], strides = [1, 1]} : vector<8x128xf32> to vector<8x32xf32>
    %282 = vector.extract_strided_slice %279 {offsets = [0, 64], sizes = [8, 32], strides = [1, 1]} : vector<8x128xf32> to vector<8x32xf32>
    %283 = vector.extract_strided_slice %278 {offsets = [0, 96], sizes = [8, 32], strides = [1, 1]} : vector<8x128xf32> to vector<8x32xf32>
    %284 = arith.mulf %281, %240 : vector<8x32xf32>
    %285 = arith.mulf %280, %282 : vector<8x32xf32>
    %286 = arith.addf %284, %285 : vector<8x32xf32>
    %287 = math.tanh %286 : vector<8x32xf32>
    %288 = arith.mulf %283, %287 : vector<8x32xf32>
    %c1_i32_81 = arith.constant 1 : i32
    %289 = arith.subi %c6_i32, %c1_i32_81 : i32
    %c8_i32_82 = arith.constant 8 : i32
    %290 = arith.muli %289, %c8_i32_82 : i32
    %291 = tpu.assume_multiple %290, 8 : i32
    %292 = arith.index_cast %291 : i32 to index
    %c0_83 = arith.constant 0 : index
    %293 = vector.load %arg15[%292, %c0_83] : memref<64x32xf32, #tpu.memory_space<vmem>>, vector<8x32xf32>
    tpu.vector_store %arg15[%292, %c0_83], %288 {strides = array<i32>} : memref<64x32xf32, #tpu.memory_space<vmem>>, vector<8x32xf32>,
    %c8_i32_84 = arith.constant 8 : i32
    %294 = arith.muli %c6_i32, %c8_i32_84 : i32
    %295 = tpu.assume_multiple %294, 8 : i32
    %296 = arith.index_cast %295 : i32 to index
    %c0_85 = arith.constant 0 : index
    %297 = vector.load %arg14[%296, %c0_85] : memref<64x128xf32, #tpu.memory_space<vmem>>, vector<8x128xf32>
    %cst_86 = arith.constant dense<0.000000e+00> : vector<8x128xf32>
    %298 = tpu.matmul %268, %7, %cst_86 {dimension_numbers = #tpu.dot_dimension_numbers<[1], [0], [0], [1], [0, 0, 1, 1], [], []>} : vector<8x32xf32>, vector<32x128xf32>, vector<8x128xf32> -> vector<8x128xf32>
    %299 = arith.addf %297, %298 : vector<8x128xf32>
    %300 = arith.negf %299 : vector<8x128xf32>
    %301 = math.exp %300 : vector<8x128xf32>
    %cst_87 = arith.constant 1.000000e+00 : f32
    %302 = vector.broadcast %cst_87 : f32 to vector<8x128xf32>
    %303 = arith.addf %302, %301 : vector<8x128xf32>
    %304 = arith.divf %302, %303 : vector<8x128xf32>
    %305 = math.tanh %299 : vector<8x128xf32>
    %306 = vector.extract_strided_slice %304 {offsets = [0, 0], sizes = [8, 32], strides = [1, 1]} : vector<8x128xf32> to vector<8x32xf32>
    %307 = vector.extract_strided_slice %304 {offsets = [0, 32], sizes = [8, 32], strides = [1, 1]} : vector<8x128xf32> to vector<8x32xf32>
    %308 = vector.extract_strided_slice %305 {offsets = [0, 64], sizes = [8, 32], strides = [1, 1]} : vector<8x128xf32> to vector<8x32xf32>
    %309 = vector.extract_strided_slice %304 {offsets = [0, 96], sizes = [8, 32], strides = [1, 1]} : vector<8x128xf32> to vector<8x32xf32>
    %310 = arith.mulf %307, %266 : vector<8x32xf32>
    %311 = arith.mulf %306, %308 : vector<8x32xf32>
    %312 = arith.addf %310, %311 : vector<8x32xf32>
    %313 = math.tanh %312 : vector<8x32xf32>
    %314 = arith.mulf %309, %313 : vector<8x32xf32>
    %cst_88 = arith.constant dense<0.000000e+00> : vector<8x128xf32>
    %315 = tpu.matmul %314, %9, %cst_88 {dimension_numbers = #tpu.dot_dimension_numbers<[1], [0], [0], [1], [0, 0, 1, 1], [], []>} : vector<8x32xf32>, vector<32x128xf32>, vector<8x128xf32> -> vector<8x128xf32>
    %316 = vector.broadcast %10 : vector<1x128xf32> to vector<8x128xf32>
    %317 = arith.addf %315, %316 : vector<8x128xf32>
    %c7_i32 = arith.constant 7 : i32
    %cst_89 = arith.constant dense<0.000000e+00> : vector<8x128xf32>
    %318 = tpu.matmul %288, %8, %cst_89 {dimension_numbers = #tpu.dot_dimension_numbers<[1], [0], [0], [1], [0, 0, 1, 1], [], []>} : vector<8x32xf32>, vector<32x128xf32>, vector<8x128xf32> -> vector<8x128xf32>
    %319 = arith.addf %317, %318 : vector<8x128xf32>
    %320 = arith.negf %319 : vector<8x128xf32>
    %321 = math.exp %320 : vector<8x128xf32>
    %cst_90 = arith.constant 1.000000e+00 : f32
    %322 = vector.broadcast %cst_90 : f32 to vector<8x128xf32>
    %323 = arith.addf %322, %321 : vector<8x128xf32>
    %324 = arith.divf %322, %323 : vector<8x128xf32>
    %325 = math.tanh %319 : vector<8x128xf32>
    %326 = vector.extract_strided_slice %324 {offsets = [0, 0], sizes = [8, 32], strides = [1, 1]} : vector<8x128xf32> to vector<8x32xf32>
    %327 = vector.extract_strided_slice %324 {offsets = [0, 32], sizes = [8, 32], strides = [1, 1]} : vector<8x128xf32> to vector<8x32xf32>
    %328 = vector.extract_strided_slice %325 {offsets = [0, 64], sizes = [8, 32], strides = [1, 1]} : vector<8x128xf32> to vector<8x32xf32>
    %329 = vector.extract_strided_slice %324 {offsets = [0, 96], sizes = [8, 32], strides = [1, 1]} : vector<8x128xf32> to vector<8x32xf32>
    %330 = arith.mulf %327, %286 : vector<8x32xf32>
    %331 = arith.mulf %326, %328 : vector<8x32xf32>
    %332 = arith.addf %330, %331 : vector<8x32xf32>
    %333 = math.tanh %332 : vector<8x32xf32>
    %334 = arith.mulf %329, %333 : vector<8x32xf32>
    %c1_i32_91 = arith.constant 1 : i32
    %335 = arith.subi %c7_i32, %c1_i32_91 : i32
    %c8_i32_92 = arith.constant 8 : i32
    %336 = arith.muli %335, %c8_i32_92 : i32
    %337 = tpu.assume_multiple %336, 8 : i32
    %338 = arith.index_cast %337 : i32 to index
    %c0_93 = arith.constant 0 : index
    %339 = vector.load %arg15[%338, %c0_93] : memref<64x32xf32, #tpu.memory_space<vmem>>, vector<8x32xf32>
    tpu.vector_store %arg15[%338, %c0_93], %334 {strides = array<i32>} : memref<64x32xf32, #tpu.memory_space<vmem>>, vector<8x32xf32>,
    %c8_i32_94 = arith.constant 8 : i32
    %340 = arith.muli %c7_i32, %c8_i32_94 : i32
    %341 = tpu.assume_multiple %340, 8 : i32
    %342 = arith.index_cast %341 : i32 to index
    %c0_95 = arith.constant 0 : index
    %343 = vector.load %arg14[%342, %c0_95] : memref<64x128xf32, #tpu.memory_space<vmem>>, vector<8x128xf32>
    %cst_96 = arith.constant dense<0.000000e+00> : vector<8x128xf32>
    %344 = tpu.matmul %314, %7, %cst_96 {dimension_numbers = #tpu.dot_dimension_numbers<[1], [0], [0], [1], [0, 0, 1, 1], [], []>} : vector<8x32xf32>, vector<32x128xf32>, vector<8x128xf32> -> vector<8x128xf32>
    %345 = arith.addf %343, %344 : vector<8x128xf32>
    %346 = arith.negf %345 : vector<8x128xf32>
    %347 = math.exp %346 : vector<8x128xf32>
    %cst_97 = arith.constant 1.000000e+00 : f32
    %348 = vector.broadcast %cst_97 : f32 to vector<8x128xf32>
    %349 = arith.addf %348, %347 : vector<8x128xf32>
    %350 = arith.divf %348, %349 : vector<8x128xf32>
    %351 = math.tanh %345 : vector<8x128xf32>
    %352 = vector.extract_strided_slice %350 {offsets = [0, 0], sizes = [8, 32], strides = [1, 1]} : vector<8x128xf32> to vector<8x32xf32>
    %353 = vector.extract_strided_slice %350 {offsets = [0, 32], sizes = [8, 32], strides = [1, 1]} : vector<8x128xf32> to vector<8x32xf32>
    %354 = vector.extract_strided_slice %351 {offsets = [0, 64], sizes = [8, 32], strides = [1, 1]} : vector<8x128xf32> to vector<8x32xf32>
    %355 = vector.extract_strided_slice %350 {offsets = [0, 96], sizes = [8, 32], strides = [1, 1]} : vector<8x128xf32> to vector<8x32xf32>
    %356 = arith.mulf %353, %312 : vector<8x32xf32>
    %357 = arith.mulf %352, %354 : vector<8x32xf32>
    %358 = arith.addf %356, %357 : vector<8x32xf32>
    %359 = math.tanh %358 : vector<8x32xf32>
    %360 = arith.mulf %355, %359 : vector<8x32xf32>
    %cst_98 = arith.constant dense<0.000000e+00> : vector<8x128xf32>
    %361 = tpu.matmul %360, %9, %cst_98 {dimension_numbers = #tpu.dot_dimension_numbers<[1], [0], [0], [1], [0, 0, 1, 1], [], []>} : vector<8x32xf32>, vector<32x128xf32>, vector<8x128xf32> -> vector<8x128xf32>
    %362 = vector.broadcast %10 : vector<1x128xf32> to vector<8x128xf32>
    %363 = arith.addf %361, %362 : vector<8x128xf32>
    %c7_i32_99 = arith.constant 7 : i32
    %cst_100 = arith.constant dense<0.000000e+00> : vector<8x128xf32>
    %364 = tpu.matmul %334, %8, %cst_100 {dimension_numbers = #tpu.dot_dimension_numbers<[1], [0], [0], [1], [0, 0, 1, 1], [], []>} : vector<8x32xf32>, vector<32x128xf32>, vector<8x128xf32> -> vector<8x128xf32>
    %365 = arith.addf %363, %364 : vector<8x128xf32>
    %366 = arith.negf %365 : vector<8x128xf32>
    %367 = math.exp %366 : vector<8x128xf32>
    %cst_101 = arith.constant 1.000000e+00 : f32
    %368 = vector.broadcast %cst_101 : f32 to vector<8x128xf32>
    %369 = arith.addf %368, %367 : vector<8x128xf32>
    %370 = arith.divf %368, %369 : vector<8x128xf32>
    %371 = math.tanh %365 : vector<8x128xf32>
    %372 = vector.extract_strided_slice %370 {offsets = [0, 0], sizes = [8, 32], strides = [1, 1]} : vector<8x128xf32> to vector<8x32xf32>
    %373 = vector.extract_strided_slice %370 {offsets = [0, 32], sizes = [8, 32], strides = [1, 1]} : vector<8x128xf32> to vector<8x32xf32>
    %374 = vector.extract_strided_slice %371 {offsets = [0, 64], sizes = [8, 32], strides = [1, 1]} : vector<8x128xf32> to vector<8x32xf32>
    %375 = vector.extract_strided_slice %370 {offsets = [0, 96], sizes = [8, 32], strides = [1, 1]} : vector<8x128xf32> to vector<8x32xf32>
    %376 = arith.mulf %373, %332 : vector<8x32xf32>
    %377 = arith.mulf %372, %374 : vector<8x32xf32>
    %378 = arith.addf %376, %377 : vector<8x32xf32>
    %379 = math.tanh %378 : vector<8x32xf32>
    %380 = arith.mulf %375, %379 : vector<8x32xf32>
    %c56_i32 = arith.constant 56 : i32
    %381 = tpu.assume_multiple %c56_i32, 8 : i32
    %382 = arith.index_cast %381 : i32 to index
    %c0_102 = arith.constant 0 : index
    %383 = vector.load %arg15[%382, %c0_102] : memref<64x32xf32, #tpu.memory_space<vmem>>, vector<8x32xf32>
    tpu.vector_store %arg15[%382, %c0_102], %380 {strides = array<i32>} : memref<64x32xf32, #tpu.memory_space<vmem>>, vector<8x32xf32>,
    %c0_103 = arith.constant 0 : index
    %c0_104 = arith.constant 0 : index
    %c0_105 = arith.constant 0 : index
    %384 = vector.load %arg12[%c0_103, %c0_104, %c0_105] : memref<2x8x32xf32, #tpu.memory_space<vmem>>, vector<1x8x32xf32>
    %385 = vector.shape_cast %384 : vector<1x8x32xf32> to vector<8x32xf32>
    %386 = vector.shape_cast %360 : vector<8x32xf32> to vector<1x8x32xf32>
    tpu.vector_store %arg12[%c0_103, %c0_104, %c0_105], %386 {strides = array<i32>} : memref<2x8x32xf32, #tpu.memory_space<vmem>>, vector<1x8x32xf32>,
    %c0_106 = arith.constant 0 : index
    %c0_107 = arith.constant 0 : index
    %c0_108 = arith.constant 0 : index
    %387 = vector.load %arg13[%c0_106, %c0_107, %c0_108] : memref<2x8x32xf32, #tpu.memory_space<vmem>>, vector<1x8x32xf32>
    %388 = vector.shape_cast %387 : vector<1x8x32xf32> to vector<8x32xf32>
    %389 = vector.shape_cast %358 : vector<8x32xf32> to vector<1x8x32xf32>
    tpu.vector_store %arg13[%c0_106, %c0_107, %c0_108], %389 {strides = array<i32>} : memref<2x8x32xf32, #tpu.memory_space<vmem>>, vector<1x8x32xf32>,
    %c1_109 = arith.constant 1 : index
    %c0_110 = arith.constant 0 : index
    %c0_111 = arith.constant 0 : index
    %390 = vector.load %arg12[%c1_109, %c0_110, %c0_111] : memref<2x8x32xf32, #tpu.memory_space<vmem>>, vector<1x8x32xf32>
    %391 = vector.shape_cast %390 : vector<1x8x32xf32> to vector<8x32xf32>
    %392 = vector.shape_cast %380 : vector<8x32xf32> to vector<1x8x32xf32>
    tpu.vector_store %arg12[%c1_109, %c0_110, %c0_111], %392 {strides = array<i32>} : memref<2x8x32xf32, #tpu.memory_space<vmem>>, vector<1x8x32xf32>,
    %c1_112 = arith.constant 1 : index
    %c0_113 = arith.constant 0 : index
    %c0_114 = arith.constant 0 : index
    %393 = vector.load %arg13[%c1_112, %c0_113, %c0_114] : memref<2x8x32xf32, #tpu.memory_space<vmem>>, vector<1x8x32xf32>
    %394 = vector.shape_cast %393 : vector<1x8x32xf32> to vector<8x32xf32>
    %395 = vector.shape_cast %378 : vector<8x32xf32> to vector<1x8x32xf32>
    tpu.vector_store %arg13[%c1_112, %c0_113, %c0_114], %395 {strides = array<i32>} : memref<2x8x32xf32, #tpu.memory_space<vmem>>, vector<1x8x32xf32>,
    %c0_115 = arith.constant 0 : index
    %c0_116 = arith.constant 0 : index
    %396 = vector.load %arg15[%c0_115, %c0_116] : memref<64x32xf32, #tpu.memory_space<vmem>>, vector<64x32xf32>
    %c0_117 = arith.constant 0 : index
    %c0_118 = arith.constant 0 : index
    %397 = vector.load %arg9[%c0_117, %c0_118] : memref<32x32xf32, #tpu.memory_space<vmem>>, vector<32x32xf32>
    %cst_119 = arith.constant dense<0.000000e+00> : vector<64x32xf32>
    %398 = tpu.matmul %396, %397, %cst_119 {dimension_numbers = #tpu.dot_dimension_numbers<[1], [0], [0], [1], [0, 0, 1, 1], [], []>} : vector<64x32xf32>, vector<32x32xf32>, vector<64x32xf32> -> vector<64x32xf32>
    %c0_120 = arith.constant 0 : index
    %c0_121 = arith.constant 0 : index
    %399 = vector.load %arg10[%c0_120, %c0_121] : memref<1x32xf32, #tpu.memory_space<vmem>>, vector<1x32xf32>
    %400 = vector.broadcast %399 : vector<1x32xf32> to vector<64x32xf32>
    %401 = arith.addf %398, %400 : vector<64x32xf32>
    %c0_122 = arith.constant 0 : index
    %c0_123 = arith.constant 0 : index
    %402 = vector.load %arg11[%c0_122, %c0_123] : memref<64x32xf32, #tpu.memory_space<vmem>>, vector<64x32xf32>
    tpu.vector_store %arg11[%c0_122, %c0_123], %401 {strides = array<i32>} : memref<64x32xf32, #tpu.memory_space<vmem>>, vector<64x32xf32>,
    return
  }
}

</mosaic_0001>

<bundles_post_ra>
// kernel: decoder_forward.1
= control target key start
LH: loop header
LB: loop body
LE: loop exit
PB: predicated region body
PF: predicated region fallthrough
CT: control target
= control target key end

     0   :  { %19 = vsyncpa [#allocation5], 0  ;;  %vm62_vm0 = vcmask 261120   ;;  %v3523_v4 = vmov 0.0|0.0   ;;  %vm3524_vm1 = vmmov 0   ;;  %v3525_v13 = vmov 0.0   ;;  %s4152_s0 = inlined_call_operand.vmem [shape: f32[64,32], index: 0, kind: input, shape index: {}]   ;;  %s4153_s1 = inlined_call_operand.vmem [shape: f32[2,8,32], index: 1, kind: input, shape index: {}]   ;;  %s4154_s2 = inlined_call_operand.vmem [shape: f32[2,8,32], index: 2, kind: input, shape index: {}]   ;;  %s4155_s3 = inlined_call_operand.vmem [shape: f32[32,128], index: 3, kind: input, shape index: {}]   ;;  %s4156_s4 = inlined_call_operand.vmem [shape: f32[32,128], index: 4, kind: input, shape index: {}]   ;;  %s4157_s5 = inlined_call_operand.vmem [shape: f32[1,128], index: 5, kind: input, shape index: {}]   ;;  %s4158_s6 = inlined_call_operand.vmem [shape: f32[32,128], index: 6, kind: input, shape index: {}]   ;;  %s4159_s7 = inlined_call_operand.vmem [shape: f32[32,128], index: 7, kind: input, shape index: {}]   ;;  %s4160_s8 = inlined_call_operand.vmem [shape: f32[1,128], index: 8, kind: input, shape index: {}]   ;;  %s4161_s9 = inlined_call_operand.vmem [shape: f32[32,32], index: 9, kind: input, shape index: {}]   ;;  %s4162_s10 = inlined_call_operand.vmem [shape: f32[1,32], index: 10, kind: input, shape index: {}]   ;;  %s4163_s11 = inlined_call_operand.vmem [shape: f32[64,32], index: 11, kind: output, shape index: {0}]   ;;  %s4164_s12 = inlined_call_operand.hbm [shape: f32[2,8,32], index: 12, kind: output, shape index: {1}]   ;;  %s4165_s13 = inlined_call_operand.hbm [shape: f32[2,8,32], index: 13, kind: output, shape index: {2}]  }
   0x1   :  { %v51_v0 = vld [vmem:[%s4155_s3] sm:$0xff]  ;;  %v52_v1 = vld [vmem:[%s4155_s3 + $0x8] sm:$0xff]  ;;  %3159 = vmatprep.subr.bf16.mxu1 %v3523_v4  ;;  %v53_v6 = vld [vmem:[%s4155_s3 + $0x10] sm:$0xff]  ;;  %2875 = vmatprep.mubr.msk.f32.mxu1 %vm3524_vm1, %v3525_v13 }
   0x2   :  { %v200_v2 = vld [vmem:[%s4156_s4] sm:$0xff]  ;;  %v3151_v3 = vpack.c.bf16 %v52_v1, %v51_v0  ;;  %v201_v5 = vld [vmem:[%s4156_s4 + $0x8] sm:$0xff]  ;;  %v54_v7 = vld [vmem:[%s4155_s3 + $0x18] sm:$0xff] }
   0x3   :  { %v3622_v8 = vpack.c.bf16 %v201_v5, %v200_v2  ;;  %v3155_v9 = vpack.c.bf16 %v54_v7, %v53_v6  ;;  %v43_v10 = vld [vmem:[%s4152_s0] sm:$0xff]  ;;  %v202_v11 = vld [vmem:[%s4156_s4 + $0x10] sm:$0xff]  ;;  %v203_v12 = vld [vmem:[%s4156_s4 + $0x18] sm:$0xff] }
   0x4   :  { %3152 = vmatprep.subr.bf16.mxu0 %v3151_v3  ;;  %2855 = vmatprep.mubr.msk.f32.mxu0 %vm62_vm0, %v43_v10 }
   0x5   :  { %20 = vsyncpa [#allocation7], 0  ;;  %3154 = vmatpush3.bf16.msra.mxu0 %v3151_v3  ;;  %3161 = vmatpush3.bf16.msra.mxu1 %v3622_v8  ;;  %v3637_v14 = vpack.c.bf16 %v203_v12, %v202_v11  ;;  %v44_v15 = vld [vmem:[%s4152_s0 + $0x8] sm:$0xff]  ;;  %v214_v16 = vld [vmem:[%s4153_s1] sm:$0xff]  ;;  %s3526_s30 = smov 64   ;;  %s3527_s16 = smov 32  }
   0x6   :  { %3156 = vmatprep.subr.bf16.mxu0 %v3155_v9  ;;  %3162 = vmatprep.subr.bf16.mxu1 %v3523_v4  ;;  %v3660_v17 = vld [vmem:[%s4157_s5] ss:$0 sm:$0xff]  ;;  %v45_v36 = vld [vmem:[%s4152_s0 + $0x10] sm:$0xff]  ;;  %v46_v37 = vld [vmem:[%s4152_s0 + $0x18] sm:$0xff]  ;;  %s3530_s29 = smov [#allocation6]  }
   0x7   :  { %v215_v25 = vld [vmem:[%s4154_s2] sm:$0xff]  ;;  %v209_v40 = vld [vmem:[%s4158_s6 + $0x8] sm:$0xff]  ;;  %v210_v42 = vld [vmem:[%s4158_s6 + $0x10] sm:$0xff]  ;;  %s2625_s14 = sshll.u32 %s3530_s29, 4  ;;  %s4111_s14 = int_to_ptr.vmem [resolvable:$true] %s2625_s14 }
   0x8   :  { %v47_v38 = vld [vmem:[%s4152_s0 + $0x20] sm:$0xff]  ;;  %v48_v43 = vld [vmem:[%s4152_s0 + $0x28] sm:$0xff]  ;;  %v211_v44 = vld [vmem:[%s4158_s6 + $0x18] sm:$0xff] }
   0x9   :  { %3158 = vmatpush3.bf16.msra.mxu0 %v3155_v9  ;;  %3164 = vmatpush3.bf16.msra.mxu1 %v3637_v14  ;;  %v208_v39 = vld [vmem:[%s4158_s6] sm:$0xff]  ;;  %v49_v45 = vld [vmem:[%s4152_s0 + $0x30] sm:$0xff]  ;;  %v3707_v46 = vpack.c.bf16 %v211_v44, %v210_v42  ;;  %v50_v47 = vld [vmem:[%s4152_s0 + $0x38] sm:$0xff] }
   0xa   :  { %3177 = vmatprep.subr.bf16.mxu0 %v3523_v4  ;;  %3165 = vmatprep.subr.bf16.mxu1 %v3523_v4  ;;  %v3691_v41 = vpack.c.bf16 %v209_v40, %v208_v39  ;;  %v204_v57 = vld [vmem:[%s4159_s7] sm:$0xff]  ;;  %v205_v58 = vld [vmem:[%s4159_s7 + $0x8] sm:$0xff]  ;;  %v206_v60 = vld [vmem:[%s4159_s7 + $0x10] sm:$0xff] }
   0xb   :  { %v3740_v59 = vpack.c.bf16 %v205_v58, %v204_v57  ;;  %v207_v61 = vld [vmem:[%s4159_s7 + $0x18] sm:$0xff]  ;;  %v2655_v0 = vld [vmem:[%s4153_s1 + $0x8] sm:$0xff]  ;;  %v3779_v6 = vld [vmem:[%s4160_s8] ss:$0 sm:$0xff] }
   0xc   :  { %2856 = vmatmul.mubr.msk.f32.vlgmr.msra.gmra.mrb[0].mxu0 %vm62_vm0, %v44_v15  ;;  %2876 = vmatmul.mubr.msk.f32.vlgmr.msra.gmra.mrb[0].mxu1 %vm62_vm0, %v214_v16  ;;  %v3751_v63 = vpack.c.bf16 %v207_v61, %v206_v60  ;;  %v2656_v15 = vld [vmem:[%s4154_s2 + $0x8] sm:$0xff] }
   0xd   :  { %3179 = vmatpush3.bf16.msra.mxu0 %v3622_v8  ;;  %2886 = vmatprep.mubr.msk.f32.mxu1 %vm3524_vm1, %v3525_v13 }
   0xe   :  { %3180 = vmatprep.subr.bf16.mxu0 %v3523_v4  ;;  %2858 = vmatprep.mubr.msk.f32.mxu0 %vm62_vm0, %v45_v36 }
   0xf   :  { %3167 = vmatpush3.bf16.msra.mxu1 %v3691_v41 }
  0x10   :  { %2859 = vmatmul.mubr.msk.f32.gmra.mrb[2].mxu0 %vm62_vm0, %v46_v37  ;;  %3168 = vmatprep.subr.bf16.mxu1 %v3523_v4 }
  0x11   :  { %3182 = vmatpush3.bf16.msra.mxu0 %v3637_v14  ;;  %2861 = vmatprep.mubr.msk.f32.mxu0 %vm62_vm0, %v47_v38 }
  0x12   :  { %3183 = vmatprep.subr.bf16.mxu0 %v3523_v4 }
  0x13   :  { %3170 = vmatpush3.bf16.msra.mxu1 %v3707_v46 }
  0x14   :  { %2862 = vmatmul.mubr.msk.f32.gmra.mrb[4].mxu0 %vm62_vm0, %v48_v43  ;;  %3171 = vmatprep.subr.bf16.mxu1 %v3523_v4 }
  0x15   :  { %2864 = vmatprep.mubr.msk.f32.mxu0 %vm62_vm0, %v49_v45 }
  0x18   :  { %2865 = vmatmul.mubr.msk.f32.gmra.mrb[6].mxu0 %vm62_vm0, %v50_v47 }
  0x19   :  { %2908 = vmatprep.mubr.msk.f32.mxu0 %vm3524_vm1, %v3525_v13 }
  0xdf   :  { %v3662_v18 = vpop.f32.mrb[0].mxu0  ;;  %v285_v19 = vpop.f32.mrb[0].mxu1 }
  0xe0   :  { %v153_v20 = vpop.f32.mrb[1].mxu0  ;;  %v2877_v21 = vpop.f32.mrb[1].mxu1  ;;  %v159_v1 = vadd.f32 %v3662_v18, %v3660_v17 }
  0xe1   :  { %v154_v22 = vadd.f32 %v3660_v17, %v153_v20 }
  0xe3   :  { %v289_v23 = vadd.f32 %v285_v19, %v154_v22  ;;  %v3722_v51 = vpop.f32.mrb[2].mxu0 }
  0xe4   :  { %v3724_v52 = vpop.f32.mrb[3].mxu0 }
  0xe5   :  { %3345 = vtanh.f32 %v289_v23  ;;  %v2652_v26 = vmul.f32 -1.442695, %v289_v23  ;;  %v164_v45 = vadd.f32 %v3660_v17, %v3724_v52 }
  0xe7   :  { %3347 = vpow2.f32 %v2652_v26  ;;  %v3726_v53 = vpop.f32.mrb[4].mxu0 }
  0xe8   :  { %v3728_v54 = vpop.f32.mrb[5].mxu0 }
  0xeb   :  { %v3730_v55 = vpop.f32.mrb[6].mxu0 }
  0xec   :  { %v3732_v56 = vpop.f32.mrb[7].mxu0 }
  0xef   :  { %v3346_v24 = vpop.eup %3345 }
  0xf0   :  { %303 = vrot.lane.b32.xlu0 %v3346_v24, %s3526_s30 }
  0xf1   :  { %v3348_v27 = vpop.eup %3347 }
  0xf2   :  { %v293_v28 = vadd.f32 1.0, %v3348_v27 }
  0xf4   :  { %298 = vrot.lane.b32.xlu0 %v215_v25, %s3527_s16  ;;  %3349 = vrcp.f32 %v293_v28 }
  0xfe   :  { %v3350_v29 = vpop.eup %3349 }
 0x162   :  { %v304_v30 = vpop.permute.xlu0 %303 }
 0x163   :  { %v306_v31 = vmul.f32 %v3350_v29, %v304_v30 }
 0x165   :  { %308 = vrot.lane.b32.xlu1 %v306_v31, %s3527_s16 }
 0x166   :  { %v299_v32 = vpop.permute.xlu0 %298 }
 0x167   :  { %v301_v33 = vmul.f32 %v3350_v29, %v299_v32 }
 0x1d7   :  { %v309_v34 = vpop.permute.xlu1 %308 }
 0x1d8   :  { %v3671_v35 = vadd.f32 %v309_v34, %v301_v33 }
 0x1da   :  { %3351 = vtanh.f32 %v3671_v35 }
 0x1e4   :  { %v3352_v48 = vpop.eup %3351 }
 0x1e5   :  { %314 = vrot.lane.b32.xlu1 %v3352_v48, %s3526_s30 }
 0x257   :  { %v315_v49 = vpop.permute.xlu1 %314 }
 0x258   :  { %v317_v50 = vmul.f32 %v3350_v29, %v315_v49 }
 0x25a   :  { %325 = vrot.lane.b32.xlu0 %v317_v50, %s3527_s16 }
 0x2cc   :  { %v326_v62 = vpop.permute.xlu0 %325 }
 0x2cd   :  { %2887 = vmatmul.mubr.msk.f32.vlgmr.msra.gmra.mrb[2].mxu1 %vm62_vm0, %v326_v62  ;;  %2909 = vmatmul.mubr.msk.f32.vlgmr.msra.gmra.mrb[8].mxu0 %vm62_vm0, %v326_v62 }
 0x2ce   :  { %3173 = vmatpush3.bf16.msra.mxu1 %v3740_v59  ;;  %2897 = vmatprep.mubr.msk.f32.mxu1 %vm3524_vm1, %v3525_v13 }
 0x2cf   :  { %3174 = vmatprep.subr.bf16.mxu1 %v3523_v4  ;;  %3185 = vmatpush3.bf16.msra.mxu0 %v3691_v41 }
 0x2d0   :  { %3186 = vmatprep.subr.bf16.mxu0 %v3523_v4  ;;  %2919 = vmatprep.mubr.msk.f32.mxu0 %vm3524_vm1, %v3525_v13 }
 0x2d2   :  { %3176 = vmatpush3.bf16.msra.mxu1 %v3751_v63 }
 0x2d3   :  { %3195 = vmatprep.subr.bf16.mxu1 %v3523_v4  ;;  %3188 = vmatpush3.bf16.msra.mxu0 %v3707_v46 }
 0x2d4   :  { %3189 = vmatprep.subr.bf16.mxu0 %v3523_v4 }
 0x2d5   :  { %2898 = vmatmul.mubr.msk.f32.vlgmr.msra.gmra.mrb[2].mxu1 %vm62_vm0, %v2655_v0 }
 0x2d6   :  { %3197 = vmatpush3.bf16.msra.mxu1 %v3622_v8  ;;  %2941 = vmatprep.mubr.msk.f32.mxu1 %vm3524_vm1, %v3525_v13 }
 0x2d7   :  { %3198 = vmatprep.subr.bf16.mxu1 %v3523_v4 }
 0x2da   :  { %3200 = vmatpush3.bf16.msra.mxu1 %v3637_v14 }
 0x2db   :  { %3201 = vmatprep.subr.bf16.mxu1 %v3523_v4 }
 0x3a0   :  { %v578_v2 = vpop.f32.mrb[8].mxu0 }
 0x3a1   :  { %v582_v3 = vadd.f32 %v578_v2, %v159_v1  ;;  %v2910_v5 = vpop.f32.mrb[9].mxu0 }
 0x3a3   :  { %3353 = vtanh.f32 %v582_v3  ;;  %v2660_v16 = vmul.f32 -1.442695, %v582_v3 }
 0x3a8   :  { %v472_v7 = vpop.f32.mrb[2].mxu1 }
 0x3a9   :  { %v3311_v9 = vadd.f32 %v3779_v6, %v472_v7  ;;  %v2899_v10 = vpop.f32.mrb[3].mxu1 }
 0x3ab   :  { %3355 = vtanh.f32 %v3311_v9  ;;  %v2658_v18 = vmul.f32 -1.442695, %v3311_v9 }
 0x3ac   :  { %3357 = vpow2.f32 %v2660_v16 }
 0x3ad   :  { %v3354_v11 = vpop.eup %3353  ;;  %3359 = vpow2.f32 %v2658_v18 }
 0x3ae   :  { %592 = vrot.lane.b32.xlu1 %v3354_v11, %s3526_s30 }
 0x3b5   :  { %v3356_v12 = vpop.eup %3355 }
 0x3b6   :  { %490 = vrot.lane.b32.xlu0 %v3356_v12, %s3526_s30  ;;  %v3358_v19 = vpop.eup %3357 }
 0x3b7   :  { %v586_v20 = vadd.f32 1.0, %v3358_v19  ;;  %v3360_v21 = vpop.eup %3359 }
 0x3b8   :  { %v480_v22 = vadd.f32 1.0, %v3360_v21 }
 0x3b9   :  { %3361 = vrcp.f32 %v586_v20 }
 0x3ba   :  { %485 = vrot.lane.b32.xlu0 %v2656_v15, %s3527_s16  ;;  %3363 = vrcp.f32 %v480_v22 }
 0x3c3   :  { %v3362_v23 = vpop.eup %3361 }
 0x3c4   :  { %v3364_v26 = vpop.eup %3363  ;;  %v590_v29 = vmul.f32 %v3362_v23, %v3671_v35 }
 0x420   :  { %v593_v24 = vpop.permute.xlu1 %592 }
 0x421   :  { %v595_v25 = vmul.f32 %v3362_v23, %v593_v24 }
 0x423   :  { %597 = vrot.lane.b32.xlu1 %v595_v25, %s3527_s16 }
 0x428   :  { %v491_v27 = vpop.permute.xlu0 %490 }
 0x429   :  { %v493_v28 = vmul.f32 %v3364_v26, %v491_v27 }
 0x42b   :  { %495 = vrot.lane.b32.xlu1 %v493_v28, %s3527_s16 }
 0x42c   :  { %v486_v32 = vpop.permute.xlu0 %485 }
 0x42d   :  { %v488_v33 = vmul.f32 %v3364_v26, %v486_v32 }
 0x495   :  { %v598_v30 = vpop.permute.xlu1 %597 }
 0x496   :  { %v3791_v31 = vadd.f32 %v598_v30, %v590_v29  ;;  %v169_v30 = vadd.f32 %v3722_v51, %v3660_v17 }
 0x498   :  { %3365 = vtanh.f32 %v3791_v31 }
 0x49d   :  { %v496_v34 = vpop.permute.xlu1 %495 }
 0x49e   :  { %v3794_v36 = vadd.f32 %v496_v34, %v488_v33 }
 0x4a0   :  { %3367 = vtanh.f32 %v3794_v36 }
 0x4a2   :  { %v3366_v37 = vpop.eup %3365 }
 0x4a3   :  { %603 = vrot.lane.b32.xlu0 %v3366_v37, %s3526_s30 }
 0x4aa   :  { %v3368_v38 = vpop.eup %3367 }
 0x4ab   :  { %501 = vrot.lane.b32.xlu1 %v3368_v38, %s3526_s30 }
 0x515   :  { %v604_v39 = vpop.permute.xlu0 %603 }
 0x516   :  { %v606_v35 = vmul.f32 %v3362_v23, %v604_v39 }
 0x518   :  { %608 = vrot.lane.b32.xlu0 %v606_v35, %s3527_s16 }
 0x51d   :  { %v502_v40 = vpop.permute.xlu1 %501 }
 0x51e   :  { %v504_v42 = vmul.f32 %v3364_v26, %v502_v40 }
 0x520   :  { %506 = vrot.lane.b32.xlu1 %v504_v42, %s3527_s16 }
 0x58a   :  { %v609_v43 = vpop.permute.xlu0 %608 }
 0x58b   :  { %2920 = vmatmul.mubr.msk.f32.vlgmr.msra.gmra.mrb[10].mxu0 %vm62_vm0, %v609_v43  ;;  %2942 = vmatmul.mubr.msk.f32.vlgmr.msra.gmra.mrb[4].mxu1 %vm62_vm0, %v609_v43 }
 0x58c   :  { %3191 = vmatpush3.bf16.msra.mxu0 %v3740_v59  ;;  %2930 = vmatprep.mubr.msk.f32.mxu0 %vm3524_vm1, %v3525_v13 }
 0x58d   :  { %3192 = vmatprep.subr.bf16.mxu0 %v3523_v4  ;;  %3203 = vmatpush3.bf16.msra.mxu1 %v3691_v41 }
 0x58e   :  { %3204 = vmatprep.subr.bf16.mxu1 %v3523_v4  ;;  %2952 = vmatprep.mubr.msk.f32.mxu1 %vm3524_vm1, %v3525_v13 }
 0x590   :  { %3194 = vmatpush3.bf16.msra.mxu0 %v3751_v63 }
 0x591   :  { %3213 = vmatprep.subr.bf16.mxu0 %v3523_v4  ;;  %3206 = vmatpush3.bf16.msra.mxu1 %v3707_v46 }
 0x592   :  { %v507_v44 = vpop.permute.xlu1 %506  ;;  %3207 = vmatprep.subr.bf16.mxu1 %v3523_v4 }
 0x593   :  { %509 = vst.msk [vmem:[#allocation3] sm:$0xff] %vm62_vm0, %v507_v44  ;;  %2931 = vmatmul.mubr.msk.f32.vlgmr.msra.gmra.mrb[10].mxu0 %vm62_vm0, %v507_v44 }
 0x594   :  { %3215 = vmatpush3.bf16.msra.mxu0 %v3622_v8  ;;  %2974 = vmatprep.mubr.msk.f32.mxu0 %vm3524_vm1, %v3525_v13 }
 0x595   :  { %3216 = vmatprep.subr.bf16.mxu0 %v3523_v4 }
 0x598   :  { %3218 = vmatpush3.bf16.msra.mxu0 %v3637_v14 }
 0x599   :  { %3219 = vmatprep.subr.bf16.mxu0 %v3523_v4 }
 0x65e   :  { %v853_v47 = vpop.f32.mrb[4].mxu1 }
 0x65f   :  { %v857_v48 = vadd.f32 %v853_v47, %v164_v45  ;;  %v2943_v49 = vpop.f32.mrb[5].mxu1 }
 0x661   :  { %3369 = vtanh.f32 %v857_v48  ;;  %v2665_v62 = vmul.f32 -1.442695, %v857_v48 }
 0x666   :  { %v750_v50 = vpop.f32.mrb[10].mxu0 }
 0x667   :  { %v3312_v57 = vadd.f32 %v3779_v6, %v750_v50  ;;  %v2932_v58 = vpop.f32.mrb[11].mxu0 }
 0x669   :  { %3371 = vtanh.f32 %v3312_v57  ;;  %v2663_v0 = vmul.f32 -1.442695, %v3312_v57 }
 0x66a   :  { %3373 = vpow2.f32 %v2665_v62 }
 0x66b   :  { %v3370_v60 = vpop.eup %3369  ;;  %3375 = vpow2.f32 %v2663_v0 }
 0x66c   :  { %867 = vrot.lane.b32.xlu0 %v3370_v60, %s3526_s30 }
 0x673   :  { %v3372_v61 = vpop.eup %3371 }
 0x674   :  { %764 = vrot.lane.b32.xlu1 %v3372_v61, %s3526_s30  ;;  %v3374_v52 = vpop.eup %3373 }
 0x675   :  { %v861_v1 = vadd.f32 1.0, %v3374_v52  ;;  %v3376_v2 = vpop.eup %3375 }
 0x676   :  { %v758_v3 = vadd.f32 1.0, %v3376_v2 }
 0x677   :  { %3377 = vrcp.f32 %v861_v1 }
 0x678   :  { %3379 = vrcp.f32 %v758_v3 }
 0x681   :  { %v3378_v5 = vpop.eup %3377 }
 0x682   :  { %v3380_v10 = vpop.eup %3379  ;;  %v865_v15 = vmul.f32 %v3378_v5, %v3791_v31 }
 0x683   :  { %v762_v19 = vmul.f32 %v3380_v10, %v3794_v36 }
 0x6de   :  { %v868_v7 = vpop.permute.xlu0 %867 }
 0x6df   :  { %v870_v9 = vmul.f32 %v3378_v5, %v868_v7 }
 0x6e1   :  { %872 = vrot.lane.b32.xlu0 %v870_v9, %s3527_s16 }
 0x6e6   :  { %v765_v11 = vpop.permute.xlu1 %764 }
 0x6e7   :  { %v767_v12 = vmul.f32 %v3380_v10, %v765_v11 }
 0x6e9   :  { %769 = vrot.lane.b32.xlu1 %v767_v12, %s3527_s16  ;;  %v174_v12 = vadd.f32 %v3660_v17, %v3728_v54 }
 0x753   :  { %v873_v16 = vpop.permute.xlu0 %872 }
 0x754   :  { %v3831_v18 = vadd.f32 %v873_v16, %v865_v15 }
 0x756   :  { %3381 = vtanh.f32 %v3831_v18 }
 0x75b   :  { %v770_v20 = vpop.permute.xlu1 %769 }
 0x75c   :  { %v3835_v21 = vadd.f32 %v770_v20, %v762_v19 }
 0x75e   :  { %3383 = vtanh.f32 %v3835_v21 }
 0x760   :  { %v3382_v22 = vpop.eup %3381 }
 0x761   :  { %878 = vrot.lane.b32.xlu0 %v3382_v22, %s3526_s30 }
 0x768   :  { %v3384_v23 = vpop.eup %3383 }
 0x769   :  { %775 = vrot.lane.b32.xlu1 %v3384_v23, %s3526_s30 }
 0x7d3   :  { %v879_v24 = vpop.permute.xlu0 %878 }
 0x7d4   :  { %v881_v25 = vmul.f32 %v3378_v5, %v879_v24 }
 0x7d6   :  { %883 = vrot.lane.b32.xlu0 %v881_v25, %s3527_s16 }
 0x7db   :  { %v776_v26 = vpop.permute.xlu1 %775 }
 0x7dc   :  { %v778_v27 = vmul.f32 %v3380_v10, %v776_v26 }
 0x7de   :  { %780 = vrot.lane.b32.xlu1 %v778_v27, %s3527_s16 }
 0x848   :  { %v884_v28 = vpop.permute.xlu0 %883 }
 0x849   :  { %2953 = vmatmul.mubr.msk.f32.vlgmr.msra.gmra.mrb[6].mxu1 %vm62_vm0, %v884_v28  ;;  %2975 = vmatmul.mubr.msk.f32.vlgmr.msra.gmra.mrb[12].mxu0 %vm62_vm0, %v884_v28 }
 0x84a   :  { %3209 = vmatpush3.bf16.msra.mxu1 %v3740_v59  ;;  %2963 = vmatprep.mubr.msk.f32.mxu1 %vm3524_vm1, %v3525_v13 }
 0x84b   :  { %3210 = vmatprep.subr.bf16.mxu1 %v3523_v4  ;;  %3221 = vmatpush3.bf16.msra.mxu0 %v3691_v41 }
 0x84c   :  { %3222 = vmatprep.subr.bf16.mxu0 %v3523_v4  ;;  %2985 = vmatprep.mubr.msk.f32.mxu0 %vm3524_vm1, %v3525_v13 }
 0x84e   :  { %3212 = vmatpush3.bf16.msra.mxu1 %v3751_v63 }
 0x84f   :  { %3231 = vmatprep.subr.bf16.mxu1 %v3523_v4  ;;  %3224 = vmatpush3.bf16.msra.mxu0 %v3707_v46 }
 0x850   :  { %v781_v29 = vpop.permute.xlu1 %780  ;;  %3225 = vmatprep.subr.bf16.mxu0 %v3523_v4 }
 0x851   :  { %784 = vst.msk [vmem:[#allocation3 + $0x8] sm:$0xff] %vm62_vm0, %v781_v29  ;;  %2964 = vmatmul.mubr.msk.f32.vlgmr.msra.gmra.mrb[6].mxu1 %vm62_vm0, %v781_v29 }
 0x852   :  { %3233 = vmatpush3.bf16.msra.mxu1 %v3622_v8  ;;  %3007 = vmatprep.mubr.msk.f32.mxu1 %vm3524_vm1, %v3525_v13 }
 0x853   :  { %3234 = vmatprep.subr.bf16.mxu1 %v3523_v4 }
 0x856   :  { %3236 = vmatpush3.bf16.msra.mxu1 %v3637_v14 }
 0x857   :  { %3237 = vmatprep.subr.bf16.mxu1 %v3523_v4 }
 0x91c   :  { %v1128_v31 = vpop.f32.mrb[12].mxu0 }
 0x91d   :  { %v1132_v32 = vadd.f32 %v1128_v31, %v169_v30  ;;  %v2976_v33 = vpop.f32.mrb[13].mxu0 }
 0x91f   :  { %3385 = vtanh.f32 %v1132_v32  ;;  %v2670_v35 = vmul.f32 -1.442695, %v1132_v32 }
 0x924   :  { %v1025_v34 = vpop.f32.mrb[6].mxu1 }
 0x925   :  { %v3313_v36 = vadd.f32 %v3779_v6, %v1025_v34  ;;  %v2965_v37 = vpop.f32.mrb[7].mxu1 }
 0x927   :  { %3387 = vtanh.f32 %v3313_v36  ;;  %v2668_v40 = vmul.f32 -1.442695, %v3313_v36 }
 0x928   :  { %3389 = vpow2.f32 %v2670_v35 }
 0x929   :  { %v3386_v38 = vpop.eup %3385  ;;  %3391 = vpow2.f32 %v2668_v40 }
 0x92a   :  { %1142 = vrot.lane.b32.xlu0 %v3386_v38, %s3526_s30 }
 0x931   :  { %v3388_v39 = vpop.eup %3387 }
 0x932   :  { %1039 = vrot.lane.b32.xlu1 %v3388_v39, %s3526_s30  ;;  %v3390_v51 = vpop.eup %3389 }
 0x933   :  { %v1136_v42 = vadd.f32 1.0, %v3390_v51  ;;  %v3392_v43 = vpop.eup %3391 }
 0x934   :  { %v1033_v44 = vadd.f32 1.0, %v3392_v43 }
 0x935   :  { %3393 = vrcp.f32 %v1136_v42 }
 0x936   :  { %3395 = vrcp.f32 %v1033_v44 }
 0x93f   :  { %v3394_v45 = vpop.eup %3393 }
 0x940   :  { %v3396_v49 = vpop.eup %3395  ;;  %v1140_v58 = vmul.f32 %v3394_v45, %v3831_v18 }
 0x941   :  { %v1037_v62 = vmul.f32 %v3396_v49, %v3835_v21 }
 0x99c   :  { %v1143_v47 = vpop.permute.xlu0 %1142 }
 0x99d   :  { %v1145_v48 = vmul.f32 %v3394_v45, %v1143_v47 }
 0x99f   :  { %1147 = vrot.lane.b32.xlu0 %v1145_v48, %s3527_s16 }
 0x9a4   :  { %v1040_v50 = vpop.permute.xlu1 %1039 }
 0x9a5   :  { %v1042_v57 = vmul.f32 %v3396_v49, %v1040_v50  ;;  %v179_v50 = vadd.f32 %v3726_v53, %v3660_v17 }
 0x9a7   :  { %1044 = vrot.lane.b32.xlu1 %v1042_v57, %s3527_s16 }
 0xa11   :  { %v1148_v60 = vpop.permute.xlu0 %1147 }
 0xa12   :  { %v3872_v61 = vadd.f32 %v1148_v60, %v1140_v58 }
 0xa14   :  { %3397 = vtanh.f32 %v3872_v61 }
 0xa19   :  { %v1045_v0 = vpop.permute.xlu1 %1044 }
 0xa1a   :  { %v3876_v52 = vadd.f32 %v1045_v0, %v1037_v62 }
 0xa1c   :  { %3399 = vtanh.f32 %v3876_v52 }
 0xa1e   :  { %v3398_v1 = vpop.eup %3397 }
 0xa1f   :  { %1153 = vrot.lane.b32.xlu0 %v3398_v1, %s3526_s30 }
 0xa26   :  { %v3400_v2 = vpop.eup %3399 }
 0xa27   :  { %1050 = vrot.lane.b32.xlu1 %v3400_v2, %s3526_s30 }
 0xa91   :  { %v1154_v3 = vpop.permute.xlu0 %1153 }
 0xa92   :  { %v1156_v5 = vmul.f32 %v3394_v45, %v1154_v3 }
 0xa94   :  { %1158 = vrot.lane.b32.xlu0 %v1156_v5, %s3527_s16 }
 0xa99   :  { %v1051_v7 = vpop.permute.xlu1 %1050 }
 0xa9a   :  { %v1053_v9 = vmul.f32 %v3396_v49, %v1051_v7 }
 0xa9c   :  { %1055 = vrot.lane.b32.xlu1 %v1053_v9, %s3527_s16 }
 0xb06   :  { %v1159_v10 = vpop.permute.xlu0 %1158 }
 0xb07   :  { %2986 = vmatmul.mubr.msk.f32.vlgmr.msra.gmra.mrb[14].mxu0 %vm62_vm0, %v1159_v10  ;;  %3008 = vmatmul.mubr.msk.f32.vlgmr.msra.gmra.mrb[8].mxu1 %vm62_vm0, %v1159_v10 }
 0xb08   :  { %3227 = vmatpush3.bf16.msra.mxu0 %v3740_v59  ;;  %2996 = vmatprep.mubr.msk.f32.mxu0 %vm3524_vm1, %v3525_v13 }
 0xb09   :  { %3228 = vmatprep.subr.bf16.mxu0 %v3523_v4  ;;  %3239 = vmatpush3.bf16.msra.mxu1 %v3691_v41 }
 0xb0a   :  { %3240 = vmatprep.subr.bf16.mxu1 %v3523_v4  ;;  %3018 = vmatprep.mubr.msk.f32.mxu1 %vm3524_vm1, %v3525_v13 }
 0xb0c   :  { %3230 = vmatpush3.bf16.msra.mxu0 %v3751_v63 }
 0xb0d   :  { %3249 = vmatprep.subr.bf16.mxu0 %v3523_v4  ;;  %3242 = vmatpush3.bf16.msra.mxu1 %v3707_v46 }
 0xb0e   :  { %v1056_v11 = vpop.permute.xlu1 %1055  ;;  %3243 = vmatprep.subr.bf16.mxu1 %v3523_v4 }
 0xb0f   :  { %1059 = vst.msk [vmem:[#allocation3 + $0x10] sm:$0xff] %vm62_vm0, %v1056_v11  ;;  %2997 = vmatmul.mubr.msk.f32.vlgmr.msra.gmra.mrb[14].mxu0 %vm62_vm0, %v1056_v11 }
 0xb10   :  { %3251 = vmatpush3.bf16.msra.mxu0 %v3622_v8  ;;  %3040 = vmatprep.mubr.msk.f32.mxu0 %vm3524_vm1, %v3525_v13 }
 0xb11   :  { %3252 = vmatprep.subr.bf16.mxu0 %v3523_v4 }
 0xb14   :  { %3254 = vmatpush3.bf16.msra.mxu0 %v3637_v14 }
 0xb15   :  { %3255 = vmatprep.subr.bf16.mxu0 %v3523_v4 }
 0xbda   :  { %v1403_v15 = vpop.f32.mrb[8].mxu1 }
 0xbdb   :  { %v1407_v16 = vadd.f32 %v1403_v15, %v174_v12  ;;  %v3009_v18 = vpop.f32.mrb[9].mxu1 }
 0xbdd   :  { %3401 = vtanh.f32 %v1407_v16  ;;  %v2675_v24 = vmul.f32 -1.442695, %v1407_v16 }
 0xbe2   :  { %v1300_v19 = vpop.f32.mrb[14].mxu0 }
 0xbe3   :  { %v3314_v20 = vadd.f32 %v3779_v6, %v1300_v19  ;;  %v2998_v21 = vpop.f32.mrb[15].mxu0 }
 0xbe5   :  { %3403 = vtanh.f32 %v3314_v20  ;;  %v2673_v25 = vmul.f32 -1.442695, %v3314_v20 }
 0xbe6   :  { %3405 = vpow2.f32 %v2675_v24 }
 0xbe7   :  { %v3402_v22 = vpop.eup %3401  ;;  %3407 = vpow2.f32 %v2673_v25 }
 0xbe8   :  { %1417 = vrot.lane.b32.xlu0 %v3402_v22, %s3526_s30 }
 0xbef   :  { %v3404_v23 = vpop.eup %3403 }
 0xbf0   :  { %1314 = vrot.lane.b32.xlu1 %v3404_v23, %s3526_s30  ;;  %v3406_v54 = vpop.eup %3405 }
 0xbf1   :  { %v1411_v26 = vadd.f32 1.0, %v3406_v54  ;;  %v3408_v27 = vpop.eup %3407 }
 0xbf2   :  { %v1308_v28 = vadd.f32 1.0, %v3408_v27 }
 0xbf3   :  { %3409 = vrcp.f32 %v1411_v26 }
 0xbf4   :  { %3411 = vrcp.f32 %v1308_v28 }
 0xbfd   :  { %v3410_v29 = vpop.eup %3409 }
 0xbfe   :  { %v3412_v32 = vpop.eup %3411  ;;  %v1415_v36 = vmul.f32 %v3410_v29, %v3872_v61 }
 0xbff   :  { %v1312_v39 = vmul.f32 %v3412_v32, %v3876_v52 }
 0xc5a   :  { %v1418_v30 = vpop.permute.xlu0 %1417 }
 0xc5b   :  { %v1420_v31 = vmul.f32 %v3410_v29, %v1418_v30 }
 0xc5d   :  { %1422 = vrot.lane.b32.xlu0 %v1420_v31, %s3527_s16 }
 0xc62   :  { %v1315_v33 = vpop.permute.xlu1 %1314 }
 0xc63   :  { %v1317_v34 = vmul.f32 %v3412_v32, %v1315_v33 }
 0xc65   :  { %1319 = vrot.lane.b32.xlu1 %v1317_v34, %s3527_s16 }
 0xccf   :  { %v1423_v37 = vpop.permute.xlu0 %1422 }
 0xcd0   :  { %v3913_v38 = vadd.f32 %v1423_v37, %v1415_v36 }
 0xcd2   :  { %3413 = vtanh.f32 %v3913_v38 }
 0xcd7   :  { %v1320_v35 = vpop.permute.xlu1 %1319 }
 0xcd8   :  { %v3917_v40 = vadd.f32 %v1320_v35, %v1312_v39 }
 0xcda   :  { %3415 = vtanh.f32 %v3917_v40 }
 0xcdc   :  { %v3414_v51 = vpop.eup %3413 }
 0xcdd   :  { %1428 = vrot.lane.b32.xlu0 %v3414_v51, %s3526_s30 }
 0xce4   :  { %v3416_v42 = vpop.eup %3415 }
 0xce5   :  { %1325 = vrot.lane.b32.xlu1 %v3416_v42, %s3526_s30 }
 0xd4f   :  { %v1429_v43 = vpop.permute.xlu0 %1428 }
 0xd50   :  { %v1431_v44 = vmul.f32 %v3410_v29, %v1429_v43 }
 0xd52   :  { %1433 = vrot.lane.b32.xlu0 %v1431_v44, %s3527_s16 }
 0xd57   :  { %v1326_v45 = vpop.permute.xlu1 %1325 }
 0xd58   :  { %v1328_v47 = vmul.f32 %v3412_v32, %v1326_v45  ;;  %v184_v32 = vadd.f32 %v3660_v17, %v3732_v56 }
 0xd5a   :  { %1330 = vrot.lane.b32.xlu1 %v1328_v47, %s3527_s16 }
 0xdc4   :  { %v1434_v48 = vpop.permute.xlu0 %1433 }
 0xdc5   :  { %3019 = vmatmul.mubr.msk.f32.vlgmr.msra.gmra.mrb[10].mxu1 %vm62_vm0, %v1434_v48  ;;  %3041 = vmatmul.mubr.msk.f32.vlgmr.msra.gmra.mrb[16].mxu0 %vm62_vm0, %v1434_v48 }
 0xdc6   :  { %3245 = vmatpush3.bf16.msra.mxu1 %v3740_v59  ;;  %3029 = vmatprep.mubr.msk.f32.mxu1 %vm3524_vm1, %v3525_v13 }
 0xdc7   :  { %3246 = vmatprep.subr.bf16.mxu1 %v3523_v4  ;;  %3257 = vmatpush3.bf16.msra.mxu0 %v3691_v41 }
 0xdc8   :  { %3258 = vmatprep.subr.bf16.mxu0 %v3523_v4  ;;  %3051 = vmatprep.mubr.msk.f32.mxu0 %vm3524_vm1, %v3525_v13 }
 0xdca   :  { %3248 = vmatpush3.bf16.msra.mxu1 %v3751_v63 }
 0xdcb   :  { %3267 = vmatprep.subr.bf16.mxu1 %v3523_v4  ;;  %3260 = vmatpush3.bf16.msra.mxu0 %v3707_v46 }
 0xdcc   :  { %v1331_v49 = vpop.permute.xlu1 %1330  ;;  %3261 = vmatprep.subr.bf16.mxu0 %v3523_v4 }
 0xdcd   :  { %1334 = vst.msk [vmem:[#allocation3 + $0x18] sm:$0xff] %vm62_vm0, %v1331_v49  ;;  %3030 = vmatmul.mubr.msk.f32.vlgmr.msra.gmra.mrb[10].mxu1 %vm62_vm0, %v1331_v49 }
 0xdce   :  { %3269 = vmatpush3.bf16.msra.mxu1 %v3622_v8  ;;  %3073 = vmatprep.mubr.msk.f32.mxu1 %vm3524_vm1, %v3525_v13 }
 0xdcf   :  { %3270 = vmatprep.subr.bf16.mxu1 %v3523_v4 }
 0xdd2   :  { %3272 = vmatpush3.bf16.msra.mxu1 %v3637_v14 }
 0xdd3   :  { %3273 = vmatprep.subr.bf16.mxu1 %v3523_v4 }
 0xe98   :  { %v1678_v57 = vpop.f32.mrb[16].mxu0 }
 0xe99   :  { %v1682_v58 = vadd.f32 %v1678_v57, %v179_v50  ;;  %v3042_v60 = vpop.f32.mrb[17].mxu0 }
 0xe9b   :  { %3417 = vtanh.f32 %v1682_v58  ;;  %v2680_v2 = vmul.f32 -1.442695, %v1682_v58 }
 0xea0   :  { %v1575_v61 = vpop.f32.mrb[10].mxu1 }
 0xea1   :  { %v3315_v62 = vadd.f32 %v3779_v6, %v1575_v61  ;;  %v3031_v0 = vpop.f32.mrb[11].mxu1 }
 0xea3   :  { %3419 = vtanh.f32 %v3315_v62  ;;  %v2678_v3 = vmul.f32 -1.442695, %v3315_v62 }
 0xea4   :  { %3421 = vpow2.f32 %v2680_v2 }
 0xea5   :  { %v3418_v52 = vpop.eup %3417  ;;  %3423 = vpow2.f32 %v2678_v3 }
 0xea6   :  { %1692 = vrot.lane.b32.xlu0 %v3418_v52, %s3526_s30 }
 0xead   :  { %v3420_v1 = vpop.eup %3419 }
 0xeae   :  { %1589 = vrot.lane.b32.xlu1 %v3420_v1, %s3526_s30  ;;  %v3422_v53 = vpop.eup %3421 }
 0xeaf   :  { %v1686_v5 = vadd.f32 1.0, %v3422_v53  ;;  %v3424_v7 = vpop.eup %3423 }
 0xeb0   :  { %v1583_v9 = vadd.f32 1.0, %v3424_v7  ;;  %v2458_v7 = vld [vmem:[%s4161_s9] sm:$0xff] }
 0xeb1   :  { %3425 = vrcp.f32 %v1686_v5 }
 0xeb2   :  { %3427 = vrcp.f32 %v1583_v9  ;;  %v2459_v9 = vld [vmem:[%s4161_s9 + $0x8] sm:$0xff] }
 0xebb   :  { %v3426_v10 = vpop.eup %3425 }
 0xebc   :  { %v3428_v15 = vpop.eup %3427  ;;  %v1690_v19 = vmul.f32 %v3426_v10, %v3913_v38 }
 0xebd   :  { %v1587_v22 = vmul.f32 %v3428_v15, %v3917_v40 }
 0xf18   :  { %v1693_v11 = vpop.permute.xlu0 %1692 }
 0xf19   :  { %v1695_v12 = vmul.f32 %v3426_v10, %v1693_v11  ;;  %v2460_v11 = vld [vmem:[%s4161_s9 + $0x10] sm:$0xff] }
 0xf1b   :  { %1697 = vrot.lane.b32.xlu0 %v1695_v12, %s3527_s16  ;;  %v2461_v12 = vld [vmem:[%s4161_s9 + $0x18] sm:$0xff] }
 0xf20   :  { %v1590_v16 = vpop.permute.xlu1 %1589 }
 0xf21   :  { %v1592_v18 = vmul.f32 %v3428_v15, %v1590_v16  ;;  %v2450_v16 = vld [vmem:[#allocation3] sm:$0xff] }
 0xf23   :  { %1594 = vrot.lane.b32.xlu1 %v1592_v18, %s3527_s16  ;;  %v2451_v18 = vld [vmem:[#allocation3 + $0x8] sm:$0xff] }
 0xf8d   :  { %v1698_v20 = vpop.permute.xlu0 %1697 }
 0xf8e   :  { %v3954_v21 = vadd.f32 %v1698_v20, %v1690_v19  ;;  %v2452_v19 = vld [vmem:[#allocation3 + $0x10] sm:$0xff] }
 0xf90   :  { %3429 = vtanh.f32 %v3954_v21 }
 0xf95   :  { %v1595_v23 = vpop.permute.xlu1 %1594 }
 0xf96   :  { %v3958_v24 = vadd.f32 %v1595_v23, %v1587_v22  ;;  %v3473_v22 = vld [vmem:[%s4157_s5] ss:$0 sm:$0xff] }
 0xf97   :  { %v189_v23 = vadd.f32 %v3473_v22, %v3730_v55 }
 0xf98   :  { %3431 = vtanh.f32 %v3958_v24 }
 0xf9a   :  { %v3430_v25 = vpop.eup %3429 }
 0xf9b   :  { %1703 = vrot.lane.b32.xlu0 %v3430_v25, %s3526_s30 }
 0xfa2   :  { %v3432_v54 = vpop.eup %3431 }
 0xfa3   :  { %1600 = vrot.lane.b32.xlu1 %v3432_v54, %s3526_s30 }
0x100d   :  { %v1704_v26 = vpop.permute.xlu0 %1703 }
0x100e   :  { %v1706_v27 = vmul.f32 %v3426_v10, %v1704_v26  ;;  %v3303_v10 = vpack.c.bf16 %v2459_v9, %v2458_v7 }
0x1010   :  { %1708 = vrot.lane.b32.xlu0 %v1706_v27, %s3527_s16 }
0x1015   :  { %v1601_v28 = vpop.permute.xlu1 %1600 }
0x1016   :  { %v1603_v29 = vmul.f32 %v3428_v15, %v1601_v28  ;;  %v3307_v15 = vpack.c.bf16 %v2461_v12, %v2460_v11 }
0x1018   :  { %1605 = vrot.lane.b32.xlu1 %v1603_v29, %s3527_s16 }
0x1082   :  { %v1709_v30 = vpop.permute.xlu0 %1708 }
0x1083   :  { %3052 = vmatmul.mubr.msk.f32.vlgmr.msra.gmra.mrb[18].mxu0 %vm62_vm0, %v1709_v30  ;;  %3074 = vmatmul.mubr.msk.f32.vlgmr.msra.gmra.mrb[12].mxu1 %vm62_vm0, %v1709_v30  ;;  %v4048_v30 = vld [vmem:[%s4162_s10] ss:$0 sm:$0xff] }
0x1084   :  { %3263 = vmatpush3.bf16.msra.mxu0 %v3740_v59  ;;  %3062 = vmatprep.mubr.msk.f32.mxu0 %vm3524_vm1, %v3525_v13 }
0x1085   :  { %3264 = vmatprep.subr.bf16.mxu0 %v3523_v4  ;;  %3275 = vmatpush3.bf16.msra.mxu1 %v3691_v41 }
0x1086   :  { %3276 = vmatprep.subr.bf16.mxu1 %v3523_v4  ;;  %3084 = vmatprep.mubr.msk.f32.mxu1 %vm3524_vm1, %v3525_v13 }
0x1088   :  { %3266 = vmatpush3.bf16.msra.mxu0 %v3751_v63 }
0x1089   :  { %3285 = vmatprep.subr.bf16.mxu0 %v3523_v4  ;;  %3278 = vmatpush3.bf16.msra.mxu1 %v3707_v46 }
0x108a   :  { %v1606_v31 = vpop.permute.xlu1 %1605  ;;  %3279 = vmatprep.subr.bf16.mxu1 %v3523_v4 }
0x108b   :  { %1609 = vst.msk [vmem:[#allocation3 + $0x20] sm:$0xff] %vm62_vm0, %v1606_v31  ;;  %3063 = vmatmul.mubr.msk.f32.vlgmr.msra.gmra.mrb[18].mxu0 %vm62_vm0, %v1606_v31 }
0x108c   :  { %3287 = vmatpush3.bf16.msra.mxu0 %v3622_v8  ;;  %3106 = vmatprep.mubr.msk.f32.mxu0 %vm3524_vm1, %v3525_v13 }
0x108d   :  { %3288 = vmatprep.subr.bf16.mxu0 %v3523_v4 }
0x1090   :  { %3290 = vmatpush3.bf16.msra.mxu0 %v3637_v14 }
0x1091   :  { %3291 = vmatprep.subr.bf16.mxu0 %v3523_v4 }
0x1092   :  { %v2454_v20 = vld [vmem:[#allocation3 + $0x20] sm:$0xff] }
0x1156   :  { %v1953_v33 = vpop.f32.mrb[12].mxu1 }
0x1157   :  { %v1957_v34 = vadd.f32 %v1953_v33, %v184_v32  ;;  %v3075_v36 = vpop.f32.mrb[13].mxu1 }
0x1159   :  { %3433 = vtanh.f32 %v1957_v34  ;;  %v2685_v14 = vmul.f32 -1.442695, %v1957_v34 }
0x115e   :  { %v1850_v37 = vpop.f32.mrb[18].mxu0 }
0x115f   :  { %v3316_v38 = vadd.f32 %v3779_v6, %v1850_v37  ;;  %v3064_v8 = vpop.f32.mrb[19].mxu0 }
0x1161   :  { %3435 = vtanh.f32 %v3316_v38  ;;  %v2683_v40 = vmul.f32 -1.442695, %v3316_v38 }
0x1162   :  { %3437 = vpow2.f32 %v2685_v14 }
0x1163   :  { %v3434_v39 = vpop.eup %3433  ;;  %3439 = vpow2.f32 %v2683_v40 }
0x1164   :  { %1967 = vrot.lane.b32.xlu0 %v3434_v39, %s3526_s30 }
0x116b   :  { %v3436_v35 = vpop.eup %3435 }
0x116c   :  { %1864 = vrot.lane.b32.xlu1 %v3436_v35, %s3526_s30  ;;  %v3438_v17 = vpop.eup %3437 }
0x116d   :  { %v1961_v56 = vadd.f32 1.0, %v3438_v17  ;;  %v3440_v51 = vpop.eup %3439 }
0x116e   :  { %v1858_v42 = vadd.f32 1.0, %v3440_v51 }
0x116f   :  { %3441 = vrcp.f32 %v1961_v56 }
0x1170   :  { %3443 = vrcp.f32 %v1858_v42 }
0x1179   :  { %v3442_v43 = vpop.eup %3441 }
0x117a   :  { %v3444_v47 = vpop.eup %3443  ;;  %v1965_v50 = vmul.f32 %v3442_v43, %v3954_v21 }
0x117b   :  { %v1862_v60 = vmul.f32 %v3444_v47, %v3958_v24 }
0x11d6   :  { %v1968_v44 = vpop.permute.xlu0 %1967 }
0x11d7   :  { %v1970_v45 = vmul.f32 %v3442_v43, %v1968_v44 }
0x11d9   :  { %1972 = vrot.lane.b32.xlu0 %v1970_v45, %s3527_s16 }
0x11de   :  { %v1865_v48 = vpop.permute.xlu1 %1864 }
0x11df   :  { %v1867_v49 = vmul.f32 %v3444_v47, %v1865_v48 }
0x11e1   :  { %1869 = vrot.lane.b32.xlu1 %v1867_v49, %s3527_s16 }
0x124b   :  { %v1973_v57 = vpop.permute.xlu0 %1972 }
0x124c   :  { %v3995_v58 = vadd.f32 %v1973_v57, %v1965_v50 }
0x124e   :  { %3445 = vtanh.f32 %v3995_v58 }
0x1253   :  { %v1870_v61 = vpop.permute.xlu1 %1869 }
0x1254   :  { %v3999_v62 = vadd.f32 %v1870_v61, %v1862_v60 }
0x1256   :  { %3447 = vtanh.f32 %v3999_v62 }
0x1258   :  { %v3446_v0 = vpop.eup %3445 }
0x1259   :  { %1978 = vrot.lane.b32.xlu0 %v3446_v0, %s3526_s30 }
0x1260   :  { %v3448_v52 = vpop.eup %3447 }
0x1261   :  { %1875 = vrot.lane.b32.xlu1 %v3448_v52, %s3526_s30 }
0x12cb   :  { %v1979_v1 = vpop.permute.xlu0 %1978 }
0x12cc   :  { %v1981_v2 = vmul.f32 %v3442_v43, %v1979_v1 }
0x12ce   :  { %1983 = vrot.lane.b32.xlu0 %v1981_v2, %s3527_s16 }
0x12d3   :  { %v1876_v3 = vpop.permute.xlu1 %1875 }
0x12d4   :  { %v1878_v53 = vmul.f32 %v3444_v47, %v1876_v3 }
0x12d6   :  { %1880 = vrot.lane.b32.xlu1 %v1878_v53, %s3527_s16 }
0x1340   :  { %v1984_v5 = vpop.permute.xlu0 %1983 }
0x1341   :  { %3085 = vmatmul.mubr.msk.f32.vlgmr.msra.gmra.mrb[14].mxu1 %vm62_vm0, %v1984_v5  ;;  %3107 = vmatmul.mubr.msk.f32.vlgmr.msra.gmra.mrb[20].mxu0 %vm62_vm0, %v1984_v5 }
0x1342   :  { %3281 = vmatpush3.bf16.msra.mxu1 %v3740_v59  ;;  %3095 = vmatprep.mubr.msk.f32.mxu1 %vm3524_vm1, %v3525_v13 }
0x1343   :  { %3282 = vmatprep.subr.bf16.mxu1 %v3523_v4  ;;  %3293 = vmatpush3.bf16.msra.mxu0 %v3691_v41 }
0x1344   :  { %3294 = vmatprep.subr.bf16.mxu0 %v3523_v4  ;;  %3117 = vmatprep.mubr.msk.f32.mxu0 %vm3524_vm1, %v3525_v13 }
0x1346   :  { %3284 = vmatpush3.bf16.msra.mxu1 %v3751_v63 }
0x1347   :  { %3304 = vmatprep.subr.bf16.mxu1 %v3303_v10  ;;  %3296 = vmatpush3.bf16.msra.mxu0 %v3707_v46  ;;  %v2453_v46 = vld [vmem:[#allocation3 + $0x18] sm:$0xff] }
0x1348   :  { %v1881_v41 = vpop.permute.xlu1 %1880  ;;  %3297 = vmatprep.subr.bf16.mxu0 %v3523_v4 }
0x1349   :  { %1884 = vst.msk [vmem:[#allocation3 + $0x28] sm:$0xff] %vm62_vm0, %v1881_v41  ;;  %3096 = vmatmul.mubr.msk.f32.vlgmr.msra.gmra.mrb[14].mxu1 %vm62_vm0, %v1881_v41 }
0x134a   :  { %3306 = vmatpush3.bf16.msra.mxu1 %v3303_v10  ;;  %3139 = vmatprep.mubr.msk.f32.mxu1 %vm62_vm0, %v2450_v16 }
0x134b   :  { %3308 = vmatprep.subr.bf16.mxu1 %v3307_v15 }
0x134e   :  { %3310 = vmatpush3.bf16.msra.mxu1 %v3307_v15 }
0x1350   :  { %v2455_v21 = vld [vmem:[#allocation3 + $0x28] sm:$0xff] }
0x1351   :  { %3140 = vmatmul.mubr.msk.f32.vlgmr.msra.gmra.mrb[16].mxu1 %vm62_vm0, %v2451_v18 }
0x1352   :  { %3142 = vmatprep.mubr.msk.f32.mxu1 %vm62_vm0, %v2452_v19 }
0x1355   :  { %3143 = vmatmul.mubr.msk.f32.gmra.mrb[18].mxu1 %vm62_vm0, %v2453_v46 }
0x1356   :  { %3145 = vmatprep.mubr.msk.f32.mxu1 %vm62_vm0, %v2454_v20 }
0x1359   :  { %3146 = vmatmul.mubr.msk.f32.gmra.mrb[20].mxu1 %vm62_vm0, %v2455_v21 }
0x1414   :  { %v2228_v24 = vpop.f32.mrb[20].mxu0 }
0x1415   :  { %v2232_v25 = vadd.f32 %v2228_v24, %v189_v23  ;;  %v3108_v54 = vpop.f32.mrb[21].mxu0 }
0x1417   :  { %3449 = vtanh.f32 %v2232_v25  ;;  %v2690_v40 = vmul.f32 -1.442695, %v2232_v25 }
0x141c   :  { %v2125_v26 = vpop.f32.mrb[14].mxu1 }
0x141d   :  { %v3317_v27 = vadd.f32 %v3779_v6, %v2125_v26  ;;  %v3097_v28 = vpop.f32.mrb[15].mxu1 }
0x141f   :  { %3451 = vtanh.f32 %v3317_v27  ;;  %v2688_v17 = vmul.f32 -1.442695, %v3317_v27 }
0x1420   :  { %3453 = vpow2.f32 %v2690_v40 }
0x1421   :  { %v3450_v29 = vpop.eup %3449  ;;  %3455 = vpow2.f32 %v2688_v17 }
0x1422   :  { %2242 = vrot.lane.b32.xlu0 %v3450_v29, %s3526_s30 }
0x1424   :  { %v3141_v31 = vpop.f32.mrb[16].mxu1 }
0x1425   :  { %v2565_v55 = vadd.f32 %v3141_v31, %v4048_v30  ;;  %v2559_v32 = vpop.f32.mrb[17].mxu1 }
0x1426   :  { %v2560_v33 = vadd.f32 %v4048_v30, %v2559_v32 }
0x1427   :  { %2599 = vst.msk [vmem:[%s4163_s11 + $0x8] sm:$0xff] %vm62_vm0, %v2565_v55 }
0x1428   :  { %2598 = vst.msk [vmem:[%s4163_s11] sm:$0xff] %vm62_vm0, %v2560_v33  ;;  %v3144_v6 = vpop.f32.mrb[18].mxu1 }
0x1429   :  { %v3452_v34 = vpop.eup %3451  ;;  %v2575_v36 = vadd.f32 %v3144_v6, %v4048_v30  ;;  %v2569_v37 = vpop.f32.mrb[19].mxu1 }
0x142a   :  { %v2570_v38 = vadd.f32 %v4048_v30, %v2569_v37  ;;  %2139 = vrot.lane.b32.xlu1 %v3452_v34, %s3526_s30  ;;  %v3454_v56 = vpop.eup %3453 }
0x142b   :  { %2601 = vst.msk [vmem:[%s4163_s11 + $0x18] sm:$0xff] %vm62_vm0, %v2575_v36  ;;  %v2236_v51 = vadd.f32 1.0, %v3454_v56  ;;  %v3456_v42 = vpop.eup %3455 }
0x142c   :  { %2600 = vst.msk [vmem:[%s4163_s11 + $0x10] sm:$0xff] %vm62_vm0, %v2570_v38  ;;  %v3147_v8 = vpop.f32.mrb[20].mxu1  ;;  %v2133_v43 = vadd.f32 1.0, %v3456_v42 }
0x142d   :  { %v2585_v39 = vadd.f32 %v3147_v8, %v4048_v30  ;;  %v2579_v35 = vpop.f32.mrb[21].mxu1  ;;  %3457 = vrcp.f32 %v2236_v51 }
0x142e   :  { %v2580_v14 = vadd.f32 %v4048_v30, %v2579_v35  ;;  %3459 = vrcp.f32 %v2133_v43 }
0x142f   :  { %2603 = vst.msk [vmem:[%s4163_s11 + $0x28] sm:$0xff] %vm62_vm0, %v2585_v39 }
0x1430   :  { %2602 = vst.msk [vmem:[%s4163_s11 + $0x20] sm:$0xff] %vm62_vm0, %v2580_v14 }
0x1437   :  { %v3458_v44 = vpop.eup %3457 }
0x1438   :  { %v3460_v48 = vpop.eup %3459  ;;  %v2240_v57 = vmul.f32 %v3458_v44, %v3995_v58 }
0x1439   :  { %v2137_v0 = vmul.f32 %v3460_v48, %v3999_v62 }
0x1494   :  { %v2243_v45 = vpop.permute.xlu0 %2242 }
0x1495   :  { %v2245_v47 = vmul.f32 %v3458_v44, %v2243_v45 }
0x1497   :  { %2247 = vrot.lane.b32.xlu0 %v2245_v47, %s3527_s16 }
0x149c   :  { %v2140_v49 = vpop.permute.xlu1 %2139 }
0x149d   :  { %v2142_v50 = vmul.f32 %v3460_v48, %v2140_v49 }
0x149f   :  { %2144 = vrot.lane.b32.xlu1 %v2142_v50, %s3527_s16 }
0x1509   :  { %v2248_v60 = vpop.permute.xlu0 %2247 }
0x150a   :  { %v2250_v61 = vadd.f32 %v2248_v60, %v2240_v57 }
0x150c   :  { %3461 = vtanh.f32 %v2250_v61 }
0x1511   :  { %v2145_v52 = vpop.permute.xlu1 %2144 }
0x1512   :  { %v2147_v1 = vadd.f32 %v2145_v52, %v2137_v0 }
0x1514   :  { %3463 = vtanh.f32 %v2147_v1 }
0x1516   :  { %v3462_v2 = vpop.eup %3461 }
0x1517   :  { %2253 = vrot.lane.b32.xlu0 %v3462_v2, %s3526_s30 }
0x151e   :  { %v3464_v3 = vpop.eup %3463 }
0x151f   :  { %2150 = vrot.lane.b32.xlu1 %v3464_v3, %s3526_s30 }
0x1589   :  { %v2254_v53 = vpop.permute.xlu0 %2253 }
0x158a   :  { %v2256_v5 = vmul.f32 %v3458_v44, %v2254_v53 }
0x158c   :  { %2258 = vrot.lane.b32.xlu0 %v2256_v5, %s3527_s16 }
0x1591   :  { %v2151_v7 = vpop.permute.xlu1 %2150 }
0x1592   :  { %v2153_v58 = vmul.f32 %v3460_v48, %v2151_v7 }
0x1594   :  { %2155 = vrot.lane.b32.xlu1 %v2153_v58, %s3527_s16 }
0x15fe   :  { %v2259_v9 = vpop.permute.xlu0 %2258 }
0x15ff   :  { %2436 = vst.msk [vmem:[#allocation4] sm:$0xff] %vm62_vm0, %v2259_v9  ;;  %3118 = vmatmul.mubr.msk.f32.vlgmr.msra.gmra.mrb[22].mxu0 %vm62_vm0, %v2259_v9 }
0x1600   :  { %3299 = vmatpush3.bf16.msra.mxu0 %v3740_v59  ;;  %3128 = vmatprep.mubr.msk.f32.mxu0 %vm3524_vm1, %v3525_v13  ;;  %v3474_v59 = vld [vmem:[%s4160_s8] ss:$0 sm:$0xff]  ;;  %s3528_s8 = smov 96  }
0x1601   :  { %3300 = vmatprep.subr.bf16.mxu0 %v3523_v4 }
0x1604   :  { %3302 = vmatpush3.bf16.msra.mxu0 %v3751_v63 }
0x1606   :  { %v2156_v62 = vpop.permute.xlu1 %2155 }
0x1607   :  { %2159 = vst.msk [vmem:[#allocation3 + $0x30] sm:$0xff] %vm62_vm0, %v2156_v62  ;;  %3129 = vmatmul.mubr.msk.f32.vlgmr.msra.gmra.mrb[22].mxu0 %vm62_vm0, %v2156_v62 }
0x160e   :  { %v2456_v10 = vld [vmem:[#allocation3 + $0x30] sm:$0xff] }
0x160f   :  { %3148 = vmatprep.mubr.msk.f32.mxu1 %vm62_vm0, %v2456_v10 }
0x16da   :  { %v2400_v11 = vpop.f32.mrb[22].mxu0 }
0x16db   :  { %v3318_v12 = vadd.f32 %v3474_v59, %v2400_v11  ;;  %v3130_v15 = vpop.f32.mrb[23].mxu0 }
0x16dd   :  { %3465 = vtanh.f32 %v3318_v12  ;;  %v2693_v4 = vmul.f32 -1.442695, %v3318_v12 }
0x16df   :  { %3467 = vpow2.f32 %v2693_v4 }
0x16e7   :  { %v3466_v13 = vpop.eup %3465 }
0x16e8   :  { %2414 = vrot.lane.b32.xlu0 %v3466_v13, %s3526_s30 }
0x16e9   :  { %v3468_v63 = vpop.eup %3467 }
0x16ea   :  { %v2408_v41 = vadd.f32 1.0, %v3468_v63 }
0x16ec   :  { %3469 = vrcp.f32 %v2408_v41 }
0x16f6   :  { %v3470_v16 = vpop.eup %3469 }
0x16f7   :  { %v2412_v46 = vmul.f32 %v3470_v16, %v2147_v1 }
0x175a   :  { %v2415_v18 = vpop.permute.xlu0 %2414 }
0x175b   :  { %v2417_v19 = vmul.f32 %v3470_v16, %v2415_v18 }
0x175d   :  { %2419 = vrot.lane.b32.xlu1 %v2417_v19, %s3527_s16 }
0x17cf   :  { %v2420_v20 = vpop.permute.xlu1 %2419 }
0x17d0   :  { %v2422_v21 = vadd.f32 %v2420_v20, %v2412_v46 }
0x17d2   :  { %3471 = vtanh.f32 %v2422_v21 }
0x17dc   :  { %v3472_v22 = vpop.eup %3471 }
0x17dd   :  { %2425 = vrot.lane.b32.xlu0 %v3472_v22, %s3526_s30  ;;  %s3529_s30 = smov [#allocation4]  }
0x17de   :  { %s2613_s28 = sshll.u32 %s3529_s30, 4  ;;  %s2614_s28 = int_to_ptr.vmem [resolvable:$true] %s2613_s28 }
0x17df   :  { %p3480_p1 = scmp.lt.s32.totalorder %s2614_s28, %s2614_s28 }
0x17e1   :  { %2438 = vrot.lane.b32.xlu0 %v2250_v61, %s3528_s8 }
0x184f   :  { %v2426_v23 = vpop.permute.xlu0 %2425 }
0x1850   :  { %v2428_v24 = vmul.f32 %v3470_v16, %v2426_v23 }
0x1852   :  { %2430 = vrot.lane.b32.xlu1 %v2428_v24, %s3527_s16  ;;  %s3475_s16 = scalar_lea.vmem %s2614_s28, 256 }
0x1853   :  { %v2439_v25 = vpop.permute.xlu0 %2438  ;;  %p3476_p0 = scmp.ne.s32.totalorder %s2614_s28, %s3475_s16  ;;  %p3481_p2 = scmp.lt.s32.totalorder %s3475_s16, %s3475_s16 }
0x1854   :  { %2441 = vst.msk [vmem:[#allocation6] sm:$0xff] %vm62_vm0, %v2439_v25 }
0x1855   :  { %p3482_p3 = por %p3481_p2, %p3480_p1 }
0x1856   :  { %2445 = vrot.lane.b32.xlu1 %v2422_v21, %s3528_s8 }
0x1857   :  { %p3483_p4 = pnand %p3482_p3, %p3476_p0 }
0x18c4   :  { %v2431_v54 = vpop.permute.xlu1 %2430 }
0x18c5   :  { %2434 = vst.msk [vmem:[#allocation3 + $0x38] sm:$0xff] %vm62_vm0, %v2431_v54  ;;  %2443 = vst.msk [vmem:[#allocation4 + $0x8] sm:$0xff] %vm62_vm0, %v2431_v54 }
0x18c8   :  { %v2446_v26 = vpop.permute.xlu1 %2445 }
0x18c9   :  { %2449 = vst.msk [vmem:[#allocation6 + $0x8] sm:$0xff] %vm62_vm0, %v2446_v26 }
0x18cc   :  { %v2457_v27 = vld [vmem:[#allocation3 + $0x38] sm:$0xff] }
0x18cd   :  { %3149 = vmatmul.mubr.msk.f32.gmra.mrb[22].mxu1 %vm62_vm0, %v2457_v27 }
0x18ce   :  { %3486 = shalt.err (!%p3483_p4)
}
0x18cf   :  { %s3487_s18 = scalar_lea.hbm %s4164_s12, 256 }
0x18d0   :  { %p3488_p5 = scmp.ne.s32.totalorder %s4164_s12, %s3487_s18  ;;  %p3491_p6 = scmp.lt.u32.totalorder %s3487_s18, %s4164_s12 }
0x18d2   :  { %p3493_p7 = pnand %p3491_p6, %p3488_p5 }
0x18d4   :  { %3496 = shalt.err (!%p3493_p7)
}
0x18d5   :  { %s3531_s20 = smov 128   ;;  %s3532_s5 = smov 8  }
0x18d6   :  { %2619 = dma.vmem_to_hbm [thread:$0]  %s2614_s28, 256, %s4164_s12, [#allocation5], %s3531_s20, %s3531_s20, %s3532_s5  }
0x18d7   :  { %s3497_s23 = scalar_lea.vmem %s4111_s14, 256  ;;  %p3502_p9 = scmp.lt.s32.totalorder %s4111_s14, %s4111_s14 }
0x18d8   :  { %p3498_p8 = scmp.ne.s32.totalorder %s4111_s14, %s3497_s23  ;;  %p3503_p10 = scmp.lt.s32.totalorder %s3497_s23, %s3497_s23 }
0x18da   :  { %p3504_p11 = por %p3503_p10, %p3502_p9 }
0x18dc   :  { %p3505_p12 = pnand %p3504_p11, %p3498_p8 }
0x18de   :  { %3508 = shalt.err (!%p3505_p12)
}
0x18df   :  { %s3509_s25 = scalar_lea.hbm %s4165_s13, 256 }
0x18e0   :  { %p3510_p13 = scmp.ne.s32.totalorder %s4165_s13, %s3509_s25  ;;  %p3513_p0 = scmp.lt.u32.totalorder %s3509_s25, %s4165_s13 }
0x18e2   :  { %p3515_p1 = pnand %p3513_p0, %p3510_p13 }
0x18e4   :  { %3518 = shalt.err (!%p3515_p1)
}
0x18e5   :  { %2631 = dma.vmem_to_hbm [thread:$0]  %s4111_s14, 256, %s4165_s13, [#allocation7], %s3531_s20, %s3531_s20, %s3532_s5  }
0x19a0   :  { %v3150_v28 = vpop.f32.mrb[22].mxu1 }
0x19a1   :  { %v2595_v29 = vadd.f32 %v3150_v28, %v4048_v30  ;;  %v2589_v31 = vpop.f32.mrb[23].mxu1 }
0x19a2   :  { %v2590_v55 = vadd.f32 %v4048_v30, %v2589_v31 }
0x19a3   :  { %2605 = vst.msk [vmem:[%s4163_s11 + $0x38] sm:$0xff] %vm62_vm0, %v2595_v29 }
0x19a4   :  { %2604 = vst.msk [vmem:[%s4163_s11 + $0x30] sm:$0xff] %vm62_vm0, %v2590_v55 }
0x19a5   :  { %3519 = dma.done.wait [#allocation5], 256  }
0x19a6   :  { %3520 = vsyncadd [#allocation5], 4294967040 }
0x19a7   :  { %3521 = dma.done.wait [#allocation7], 256  }
0x19a8   :  { %3522 = vsyncadd [#allocation7], 4294967040 }
0x19a9   :  { %2640 = vsyncpa [#allocation5], 1 }
0x19aa   :  { %2641 = vsyncpa [#allocation7], 1 }

</bundles_post_ra>
